<compile_context>
chip_gen: v7x
topology: tpu7x:2x2x1
jax: 0.10.0
libtpu: 0.0.40
codegen_flags: <defaults>
</compile_context>

<pallas_src>
import jax
import jax.numpy as jnp
from jax.experimental import pallas as pl
from jax.experimental.pallas import tpu as pltpu

_VMEM_LIMIT = 48 * 1024 * 1024  # > 16/32 MiB defaults, < v7x's 64 MiB physical


# --------------------------------------------------------------------------
# 3x3 conv: direct, halo-block, tap-accumulated matmuls
# --------------------------------------------------------------------------
def _conv_taps(x_ref, w_ref, th, w, cin, tco):
    """Accumulate the 9 taps of a 3x3 conv as shifted-slice MXU matmuls."""
    xf = x_ref[...]                                     # (th+2, w+2, cin)
    acc = jnp.zeros((th * w, tco), jnp.float32)
    for dy in range(3):
        for dx in range(3):
            xs = xf[dy:dy + th, dx:dx + w, :].reshape(th * w, cin)
            acc = acc + jnp.dot(xs, w_ref[dy * 3 + dx],
                                preferred_element_type=jnp.float32)
    return acc


def _conv3x3_kernel(x_ref, w_ref, b_ref, o_ref):
    th, w, tco = o_ref.shape
    cin = x_ref.shape[-1]
    acc = _conv_taps(x_ref, w_ref, th, w, cin, tco) + b_ref[...]
    o_ref[...] = acc.reshape(th, w, tco).astype(o_ref.dtype)


def _conv3x3_res_kernel(x_ref, w_ref, b_ref, r_ref, o_ref):
    th, w, tco = o_ref.shape
    cin = x_ref.shape[-1]
    acc = _conv_taps(x_ref, w_ref, th, w, cin, tco) + b_ref[...]
    o_ref[...] = (acc.reshape(th, w, tco) + r_ref[...]).astype(o_ref.dtype)


def _pick_row_tile(h):
    if h <= 64:
        return h
    for th in (64, 32, 16, 8):
        if h % th == 0:
            return th
    return h


def conv3x3(x_nhwc, w_hwio, b, residual=None):
    """3x3 / stride 1 / pad 1 conv (+bias, +optional residual). NHWC, HWIO."""
    B, H, W, Cin = x_nhwc.shape
    Cout = w_hwio.shape[-1]
    th = _pick_row_tile(H)                  # row tile (works best with W % 8 == 0)
    nt = H // th
    tco = Cout if Cout <= 128 else 128      # lane-dense cout tile for big Cout
    nco = pl.cdiv(Cout, tco)

    xp = jnp.pad(x_nhwc, ((0, 0), (1, 1), (1, 1), (0, 0)))
    # Overlapping row windows (halo of 1 row each side): only ~2/th extra bytes.
    xh = jnp.stack([xp[:, i * th:i * th + th + 2] for i in range(nt)], axis=1)
    w3 = w_hwio.reshape(9, Cin, Cout)       # tap-major, (dy*3+dx, ci, co)
    b2 = b.reshape(1, Cout)

    x_spec = pl.BlockSpec((None, None, th + 2, W + 2, Cin),
                          lambda bi, ti, ci: (bi, ti, 0, 0, 0))
    w_spec = pl.BlockSpec((9, Cin, tco), lambda bi, ti, ci: (0, 0, ci))
    b_spec = pl.BlockSpec((1, tco), lambda bi, ti, ci: (0, ci))
    o_spec = pl.BlockSpec((None, None, th, W, tco),
                          lambda bi, ti, ci: (bi, ti, 0, 0, ci))
    out_shape = jax.ShapeDtypeStruct((B, nt, th, W, Cout), x_nhwc.dtype)

    itemsize = x_nhwc.dtype.itemsize
    res_bytes = 0 if residual is None else residual.size * itemsize
    cost = pl.CostEstimate(
        flops=2 * B * H * W * 9 * Cin * Cout,
        transcendentals=0,
        bytes_accessed=int((xh.size + w3.size + b2.size + B * H * W * Cout)
                           * itemsize + res_bytes),
    )
    cparams = pltpu.CompilerParams(
        dimension_semantics=("parallel", "parallel", "parallel"),
        vmem_limit_bytes=_VMEM_LIMIT,
    )

    if residual is None:
        out = pl.pallas_call(
            _conv3x3_kernel,
            grid=(B, nt, nco),
            in_specs=[x_spec, w_spec, b_spec],
            out_specs=o_spec,
            out_shape=out_shape,
            compiler_params=cparams,
            cost_estimate=cost,
        )(xh, w3, b2)
    else:
        r5 = residual.reshape(B, nt, th, W, Cout)
        r_spec = pl.BlockSpec((None, None, th, W, tco),
                              lambda bi, ti, ci: (bi, ti, 0, 0, ci))
        out = pl.pallas_call(
            _conv3x3_res_kernel,
            grid=(B, nt, nco),
            in_specs=[x_spec, w_spec, b_spec, r_spec],
            out_specs=o_spec,
            out_shape=out_shape,
            compiler_params=cparams,
            cost_estimate=cost,
        )(xh, w3, b2, r5)
    return out.reshape(B, H, W, Cout)


# --------------------------------------------------------------------------
# Fused LowThresholdDC + HighThresholdDC kernel
#   out = (x - m) * A + m * B
#     lt channels ([0,C)):  m = per-quadrant mean, A = h[c,p1,p2], B = l[c,p1,p2]
#     ht channels ([C,2C)): m = global mean,       A = fscale_h+1, B = fscale_d
# --------------------------------------------------------------------------
def _decouple_kernel(x_ref, a_ref, b_ref, m_ref, o_ref):
    p, w1, _, w2, _ = x_ref.shape
    x = x_ref[...].astype(jnp.float32)                       # (P, W1, P, W2, TC)
    qsum = jnp.sum(jnp.sum(x, axis=3, keepdims=True), axis=1, keepdims=True)
    quad = qsum * (1.0 / float(w1 * w2))                     # (P, 1, P, 1, TC)
    gsum = jnp.sum(jnp.sum(qsum, axis=2, keepdims=True), axis=0, keepdims=True)
    glob = gsum * (1.0 / float(p * p * w1 * w2))             # (1, 1, 1, 1, TC)
    msk = m_ref[...]                                         # 1 -> quad, 0 -> glob
    m = msk * quad + (1.0 - msk) * glob
    out = (x - m) * a_ref[...] + m * b_ref[...]
    o_ref[...] = out.astype(o_ref.dtype)


def decouple(y1, h_param, l_param, fscale_h, fscale_d, patch_size):
    B, H, W, C2 = y1.shape
    C = C2 // 2
    P = patch_size
    W1, W2 = H // P, W // P

    # Per-(p1, p2, channel) scale tables covering both channel halves.
    hq = jnp.transpose(h_param.reshape(C, P, P), (1, 2, 0))          # (P, P, C)
    lq = jnp.transpose(l_param.reshape(C, P, P), (1, 2, 0))
    fh1 = jnp.broadcast_to((fscale_h + 1.0)[None, None, :], (P, P, C))
    fd = jnp.broadcast_to(fscale_d[None, None, :], (P, P, C))
    a_tab = jnp.concatenate([hq, fh1], axis=-1).reshape(P, 1, P, 1, C2)
    b_tab = jnp.concatenate([lq, fd], axis=-1).reshape(P, 1, P, 1, C2)
    msk = jnp.concatenate([jnp.ones((C,), jnp.float32),
                           jnp.zeros((C,), jnp.float32)]).reshape(1, 1, 1, 1, C2)

    xr = y1.reshape(B, P, W1, P, W2, C2)         # free row-major view of (B,H,W,2C)
    tc = C2 if C2 <= 256 else 128                # channel slab (means are per-channel)
    ncs = pl.cdiv(C2, tc)

    x_spec = pl.BlockSpec((None, P, W1, P, W2, tc),
                          lambda bi, ci: (bi, 0, 0, 0, 0, ci))
    s_spec = pl.BlockSpec((P, 1, P, 1, tc), lambda bi, ci: (0, 0, 0, 0, ci))
    m_spec = pl.BlockSpec((1, 1, 1, 1, tc), lambda bi, ci: (0, 0, 0, 0, ci))

    nbytes = y1.size * y1.dtype.itemsize
    out = pl.pallas_call(
        _decouple_kernel,
        grid=(B, ncs),
        in_specs=[x_spec, s_spec, s_spec, m_spec],
        out_specs=x_spec,
        out_shape=jax.ShapeDtypeStruct(xr.shape, y1.dtype),
        compiler_params=pltpu.CompilerParams(
            dimension_semantics=("parallel", "parallel"),
            vmem_limit_bytes=_VMEM_LIMIT),
        cost_estimate=pl.CostEstimate(flops=8 * y1.size, transcendentals=0,
                                      bytes_accessed=int(2 * nbytes)),
    )(xr, a_tab, b_tab, msk)
    return out.reshape(B, H, W, C2)


# --------------------------------------------------------------------------
# Full DecoupleConv forward
# --------------------------------------------------------------------------
def decouple_conv_forward(x_nchw, params, patch_size=2):
    x = jnp.transpose(x_nchw, (0, 2, 3, 1))          # NCHW -> NHWC
    y1 = conv3x3(x, params["w1"], params["b1"])      # (B, H, W, 2*out_ch)
    # Fused ltdc/htdc: reads the 2C-channel conv1 output, writes the already
    # concatenated 2C-channel conv2 input (no chunk / concat round trips).
    x2 = decouple(y1, params["h"], params["l"], params["fscale_h"],
                  params["fscale_d"], patch_size)
    y2 = conv3x3(x2, params["w2"], params["b2"], residual=x)   # + input
    return jnp.transpose(y2, (0, 3, 1, 2))           # NHWC -> NCHW


# --------------------------------------------------------------------------
# Pure-JAX reference (no Pallas) for verification
# --------------------------------------------------------------------------
def _conv3x3_ref(x, w, b):
    y = jax.lax.conv_general_dilated(
        x, w, window_strides=(1, 1), padding=((1, 1), (1, 1)),
        dimension_numbers=("NHWC", "HWIO", "NHWC"),
        precision=jax.lax.Precision.HIGHEST)
    return y + b.reshape(1, 1, 1, -1)


def ref_forward(x_nchw, params, patch_size=2):
    x = jnp.transpose(x_nchw, (0, 2, 3, 1))
    out_ch = params["w2"].shape[-1]
    y1 = _conv3x3_ref(x, params["w1"], params["b1"])
    lt, ht = y1[..., :out_ch], y1[..., out_ch:]
    B, H, W, C = lt.shape
    P = patch_size
    W1, W2 = H // P, W // P
    # LowThresholdDC
    lt_r = lt.reshape(B, P, W1, P, W2, C)
    low = jnp.mean(lt_r, axis=(2, 4), keepdims=True)
    h_b = jnp.transpose(params["h"].reshape(C, P, P), (1, 2, 0))[None, :, None, :, None, :]
    l_b = jnp.transpose(params["l"].reshape(C, P, P), (1, 2, 0))[None, :, None, :, None, :]
    lt_out = ((lt_r - low) * h_b + low * l_b).reshape(B, H, W, C)
    # HighThresholdDC
    xd = jnp.mean(ht, axis=(1, 2), keepdims=True)
    ht_out = ((ht - xd) * (params["fscale_h"].reshape(1, 1, 1, C) + 1.0)
              + xd * params["fscale_d"].reshape(1, 1, 1, C))
    x2 = jnp.concatenate([lt_out, ht_out], axis=-1)
    y2 = _conv3x3_ref(x2, params["w2"], params["b2"]) + x
    return jnp.transpose(y2, (0, 3, 1, 2))


# --------------------------------------------------------------------------
# Deterministic parameter init (shapes follow the PyTorch __init__)
# --------------------------------------------------------------------------
def init_params(key, in_ch, out_ch, patch_size=2):
    ks = jax.random.split(key, 8)
    p = {}
    p["w1"] = 0.1 * jax.random.normal(ks[0], (3, 3, in_ch, 2 * out_ch), jnp.float32)
    p["b1"] = 0.1 * jax.random.normal(ks[1], (2 * out_ch,), jnp.float32)
    p["w2"] = 0.1 * jax.random.normal(ks[2], (3, 3, 2 * out_ch, out_ch), jnp.float32)
    p["b2"] = 0.1 * jax.random.normal(ks[3], (out_ch,), jnp.float32)
    # PyTorch initializes these to zeros; use small random values so the
    # decouple math is actually exercised numerically.
    p["h"] = 0.1 * jax.random.normal(ks[4], (out_ch * patch_size ** 2,), jnp.float32)
    p["l"] = 0.1 * jax.random.normal(ks[5], (out_ch * patch_size ** 2,), jnp.float32)
    p["fscale_h"] = 0.1 * jax.random.normal(ks[6], (out_ch,), jnp.float32)
    p["fscale_d"] = 0.1 * jax.random.normal(ks[7], (out_ch,), jnp.float32)
    return p


if __name__ == "__main__":
    key = jax.random.PRNGKey(0)
    kx, kp = jax.random.split(key)

    B, C, H, W = 2, 4, 16, 16
    in_ch = out_ch = C                 # residual add requires in_ch == out_ch
    x = jax.random.normal(kx, (B, C, H, W), jnp.float32)   # NCHW, like PyTorch
    params = init_params(kp, in_ch, out_ch, patch_size=2)

    out = decouple_conv_forward(x, params, patch_size=2)
    out = jax.block_until_ready(out)

    ref = ref_forward(x, params, patch_size=2)
    assert out.shape == (B, out_ch, H, W)
    max_err = float(jnp.max(jnp.abs(out - ref)))
    assert jnp.allclose(out, ref, atol=1e-3, rtol=1e-3), max_err

    print("KERNEL_OK")
</pallas_src>

<mosaic_0001>
module attributes {stable_mosaic.version = 11 : i64} {
  func.func @_conv3x3_kernel(%arg0: i32, %arg1: i32, %arg2: i32, %arg3: memref<1x1x18x18x4xf32, #tpu.memory_space<vmem>>, %arg4: memref<9x4x8xf32, #tpu.memory_space<vmem>>, %arg5: memref<1x8xf32, #tpu.memory_space<vmem>>, %arg6: memref<1x1x16x16x8xf32, #tpu.memory_space<vmem>>) attributes {dimension_semantics = [#tpu.dimension_semantics<parallel>, #tpu.dimension_semantics<parallel>, #tpu.dimension_semantics<parallel>], iteration_bounds = array<i64: 2, 1, 1>, scalar_prefetch = 0 : i64, scratch_operands = 0 : i64, tpu.core_type = #tpu.core_type<tc>, window_params = [{transform_indices = @transform_0, window_bounds = array<i64: 1, 1, 18, 18, 4>}, {transform_indices = @transform_1, window_bounds = array<i64: 9, 4, 8>}, {transform_indices = @transform_2, window_bounds = array<i64: 1, 8>}, {transform_indices = @transform_3, window_bounds = array<i64: 1, 1, 16, 16, 8>}]} {
    %c0 = arith.constant 0 : index
    %c0_0 = arith.constant 0 : index
    %c0_1 = arith.constant 0 : index
    %c0_2 = arith.constant 0 : index
    %c0_3 = arith.constant 0 : index
    %0 = vector.load %arg3[%c0, %c0_0, %c0_1, %c0_2, %c0_3] : memref<1x1x18x18x4xf32, #tpu.memory_space<vmem>>, vector<1x1x18x18x4xf32>
    %1 = vector.shape_cast %0 : vector<1x1x18x18x4xf32> to vector<18x18x4xf32>
    %cst = arith.constant 0.000000e+00 : f32
    %2 = vector.broadcast %cst : f32 to vector<256x8xf32>
    %3 = vector.extract_strided_slice %1 {offsets = [0, 0, 0], sizes = [16, 16, 4], strides = [1, 1, 1]} : vector<18x18x4xf32> to vector<16x16x4xf32>
    %4 = vector.shape_cast %3 : vector<16x16x4xf32> to vector<256x4xf32>
    %c0_4 = arith.constant 0 : index
    %c0_5 = arith.constant 0 : index
    %c0_6 = arith.constant 0 : index
    %5 = vector.load %arg4[%c0_4, %c0_5, %c0_6] : memref<9x4x8xf32, #tpu.memory_space<vmem>>, vector<1x4x8xf32>
    %6 = vector.shape_cast %5 : vector<1x4x8xf32> to vector<4x8xf32>
    %cst_7 = arith.constant dense<0.000000e+00> : vector<256x8xf32>
    %7 = tpu.matmul %4, %6, %cst_7 {dimension_numbers = #tpu.dot_dimension_numbers<[1], [0], [0], [1], [0, 0, 1, 1], [], []>} : vector<256x4xf32>, vector<4x8xf32>, vector<256x8xf32> -> vector<256x8xf32>
    %8 = arith.addf %2, %7 : vector<256x8xf32>
    %9 = vector.extract_strided_slice %1 {offsets = [0, 1, 0], sizes = [16, 16, 4], strides = [1, 1, 1]} : vector<18x18x4xf32> to vector<16x16x4xf32>
    %10 = vector.shape_cast %9 : vector<16x16x4xf32> to vector<256x4xf32>
    %c1 = arith.constant 1 : index
    %c0_8 = arith.constant 0 : index
    %c0_9 = arith.constant 0 : index
    %11 = vector.load %arg4[%c1, %c0_8, %c0_9] : memref<9x4x8xf32, #tpu.memory_space<vmem>>, vector<1x4x8xf32>
    %12 = vector.shape_cast %11 : vector<1x4x8xf32> to vector<4x8xf32>
    %cst_10 = arith.constant dense<0.000000e+00> : vector<256x8xf32>
    %13 = tpu.matmul %10, %12, %cst_10 {dimension_numbers = #tpu.dot_dimension_numbers<[1], [0], [0], [1], [0, 0, 1, 1], [], []>} : vector<256x4xf32>, vector<4x8xf32>, vector<256x8xf32> -> vector<256x8xf32>
    %14 = arith.addf %8, %13 : vector<256x8xf32>
    %15 = vector.extract_strided_slice %1 {offsets = [0, 2, 0], sizes = [16, 16, 4], strides = [1, 1, 1]} : vector<18x18x4xf32> to vector<16x16x4xf32>
    %16 = vector.shape_cast %15 : vector<16x16x4xf32> to vector<256x4xf32>
    %c2 = arith.constant 2 : index
    %c0_11 = arith.constant 0 : index
    %c0_12 = arith.constant 0 : index
    %17 = vector.load %arg4[%c2, %c0_11, %c0_12] : memref<9x4x8xf32, #tpu.memory_space<vmem>>, vector<1x4x8xf32>
    %18 = vector.shape_cast %17 : vector<1x4x8xf32> to vector<4x8xf32>
    %cst_13 = arith.constant dense<0.000000e+00> : vector<256x8xf32>
    %19 = tpu.matmul %16, %18, %cst_13 {dimension_numbers = #tpu.dot_dimension_numbers<[1], [0], [0], [1], [0, 0, 1, 1], [], []>} : vector<256x4xf32>, vector<4x8xf32>, vector<256x8xf32> -> vector<256x8xf32>
    %20 = arith.addf %14, %19 : vector<256x8xf32>
    %21 = vector.extract_strided_slice %1 {offsets = [1, 0, 0], sizes = [16, 16, 4], strides = [1, 1, 1]} : vector<18x18x4xf32> to vector<16x16x4xf32>
    %22 = vector.shape_cast %21 : vector<16x16x4xf32> to vector<256x4xf32>
    %c3 = arith.constant 3 : index
    %c0_14 = arith.constant 0 : index
    %c0_15 = arith.constant 0 : index
    %23 = vector.load %arg4[%c3, %c0_14, %c0_15] : memref<9x4x8xf32, #tpu.memory_space<vmem>>, vector<1x4x8xf32>
    %24 = vector.shape_cast %23 : vector<1x4x8xf32> to vector<4x8xf32>
    %cst_16 = arith.constant dense<0.000000e+00> : vector<256x8xf32>
    %25 = tpu.matmul %22, %24, %cst_16 {dimension_numbers = #tpu.dot_dimension_numbers<[1], [0], [0], [1], [0, 0, 1, 1], [], []>} : vector<256x4xf32>, vector<4x8xf32>, vector<256x8xf32> -> vector<256x8xf32>
    %26 = arith.addf %20, %25 : vector<256x8xf32>
    %27 = vector.extract_strided_slice %1 {offsets = [1, 1, 0], sizes = [16, 16, 4], strides = [1, 1, 1]} : vector<18x18x4xf32> to vector<16x16x4xf32>
    %28 = vector.shape_cast %27 : vector<16x16x4xf32> to vector<256x4xf32>
    %c4 = arith.constant 4 : index
    %c0_17 = arith.constant 0 : index
    %c0_18 = arith.constant 0 : index
    %29 = vector.load %arg4[%c4, %c0_17, %c0_18] : memref<9x4x8xf32, #tpu.memory_space<vmem>>, vector<1x4x8xf32>
    %30 = vector.shape_cast %29 : vector<1x4x8xf32> to vector<4x8xf32>
    %cst_19 = arith.constant dense<0.000000e+00> : vector<256x8xf32>
    %31 = tpu.matmul %28, %30, %cst_19 {dimension_numbers = #tpu.dot_dimension_numbers<[1], [0], [0], [1], [0, 0, 1, 1], [], []>} : vector<256x4xf32>, vector<4x8xf32>, vector<256x8xf32> -> vector<256x8xf32>
    %32 = arith.addf %26, %31 : vector<256x8xf32>
    %33 = vector.extract_strided_slice %1 {offsets = [1, 2, 0], sizes = [16, 16, 4], strides = [1, 1, 1]} : vector<18x18x4xf32> to vector<16x16x4xf32>
    %34 = vector.shape_cast %33 : vector<16x16x4xf32> to vector<256x4xf32>
    %c5 = arith.constant 5 : index
    %c0_20 = arith.constant 0 : index
    %c0_21 = arith.constant 0 : index
    %35 = vector.load %arg4[%c5, %c0_20, %c0_21] : memref<9x4x8xf32, #tpu.memory_space<vmem>>, vector<1x4x8xf32>
    %36 = vector.shape_cast %35 : vector<1x4x8xf32> to vector<4x8xf32>
    %cst_22 = arith.constant dense<0.000000e+00> : vector<256x8xf32>
    %37 = tpu.matmul %34, %36, %cst_22 {dimension_numbers = #tpu.dot_dimension_numbers<[1], [0], [0], [1], [0, 0, 1, 1], [], []>} : vector<256x4xf32>, vector<4x8xf32>, vector<256x8xf32> -> vector<256x8xf32>
    %38 = arith.addf %32, %37 : vector<256x8xf32>
    %39 = vector.extract_strided_slice %1 {offsets = [2, 0, 0], sizes = [16, 16, 4], strides = [1, 1, 1]} : vector<18x18x4xf32> to vector<16x16x4xf32>
    %40 = vector.shape_cast %39 : vector<16x16x4xf32> to vector<256x4xf32>
    %c6 = arith.constant 6 : index
    %c0_23 = arith.constant 0 : index
    %c0_24 = arith.constant 0 : index
    %41 = vector.load %arg4[%c6, %c0_23, %c0_24] : memref<9x4x8xf32, #tpu.memory_space<vmem>>, vector<1x4x8xf32>
    %42 = vector.shape_cast %41 : vector<1x4x8xf32> to vector<4x8xf32>
    %cst_25 = arith.constant dense<0.000000e+00> : vector<256x8xf32>
    %43 = tpu.matmul %40, %42, %cst_25 {dimension_numbers = #tpu.dot_dimension_numbers<[1], [0], [0], [1], [0, 0, 1, 1], [], []>} : vector<256x4xf32>, vector<4x8xf32>, vector<256x8xf32> -> vector<256x8xf32>
    %44 = arith.addf %38, %43 : vector<256x8xf32>
    %45 = vector.extract_strided_slice %1 {offsets = [2, 1, 0], sizes = [16, 16, 4], strides = [1, 1, 1]} : vector<18x18x4xf32> to vector<16x16x4xf32>
    %46 = vector.shape_cast %45 : vector<16x16x4xf32> to vector<256x4xf32>
    %c7 = arith.constant 7 : index
    %c0_26 = arith.constant 0 : index
    %c0_27 = arith.constant 0 : index
    %47 = vector.load %arg4[%c7, %c0_26, %c0_27] : memref<9x4x8xf32, #tpu.memory_space<vmem>>, vector<1x4x8xf32>
    %48 = vector.shape_cast %47 : vector<1x4x8xf32> to vector<4x8xf32>
    %cst_28 = arith.constant dense<0.000000e+00> : vector<256x8xf32>
    %49 = tpu.matmul %46, %48, %cst_28 {dimension_numbers = #tpu.dot_dimension_numbers<[1], [0], [0], [1], [0, 0, 1, 1], [], []>} : vector<256x4xf32>, vector<4x8xf32>, vector<256x8xf32> -> vector<256x8xf32>
    %50 = arith.addf %44, %49 : vector<256x8xf32>
    %51 = vector.extract_strided_slice %1 {offsets = [2, 2, 0], sizes = [16, 16, 4], strides = [1, 1, 1]} : vector<18x18x4xf32> to vector<16x16x4xf32>
    %52 = vector.shape_cast %51 : vector<16x16x4xf32> to vector<256x4xf32>
    %c8 = arith.constant 8 : index
    %c0_29 = arith.constant 0 : index
    %c0_30 = arith.constant 0 : index
    %53 = vector.load %arg4[%c8, %c0_29, %c0_30] : memref<9x4x8xf32, #tpu.memory_space<vmem>>, vector<1x4x8xf32>
    %54 = vector.shape_cast %53 : vector<1x4x8xf32> to vector<4x8xf32>
    %cst_31 = arith.constant dense<0.000000e+00> : vector<256x8xf32>
    %55 = tpu.matmul %52, %54, %cst_31 {dimension_numbers = #tpu.dot_dimension_numbers<[1], [0], [0], [1], [0, 0, 1, 1], [], []>} : vector<256x4xf32>, vector<4x8xf32>, vector<256x8xf32> -> vector<256x8xf32>
    %56 = arith.addf %50, %55 : vector<256x8xf32>
    %c0_32 = arith.constant 0 : index
    %c0_33 = arith.constant 0 : index
    %57 = vector.load %arg5[%c0_32, %c0_33] : memref<1x8xf32, #tpu.memory_space<vmem>>, vector<1x8xf32>
    %58 = vector.broadcast %57 : vector<1x8xf32> to vector<256x8xf32>
    %59 = arith.addf %56, %58 : vector<256x8xf32>
    %60 = vector.shape_cast %59 : vector<256x8xf32> to vector<16x16x8xf32>
    %c0_34 = arith.constant 0 : index
    %c0_35 = arith.constant 0 : index
    %c0_36 = arith.constant 0 : index
    %c0_37 = arith.constant 0 : index
    %c0_38 = arith.constant 0 : index
    %61 = vector.load %arg6[%c0_34, %c0_35, %c0_36, %c0_37, %c0_38] : memref<1x1x16x16x8xf32, #tpu.memory_space<vmem>>, vector<1x1x16x16x8xf32>
    %62 = vector.shape_cast %61 : vector<1x1x16x16x8xf32> to vector<16x16x8xf32>
    %63 = vector.shape_cast %60 : vector<16x16x8xf32> to vector<1x1x16x16x8xf32>
    tpu.vector_store %arg6[%c0_34, %c0_35, %c0_36, %c0_37, %c0_38], %63 {strides = array<i32>} : memref<1x1x16x16x8xf32, #tpu.memory_space<vmem>>, vector<1x1x16x16x8xf32>,
    return
  }
  func.func @transform_0(%arg0: i32, %arg1: i32, %arg2: i32) -> (i32, i32, i32, i32, i32) {
    %c0_i32 = arith.constant 0 : i32
    %c0_i32_0 = arith.constant 0 : i32
    %c0_i32_1 = arith.constant 0 : i32
    %c0_i32_2 = arith.constant 0 : i32
    return %arg0, %arg1, %c0_i32, %c0_i32_0, %c0_i32_1 : i32, i32, i32, i32, i32
  }
  func.func @transform_1(%arg0: i32, %arg1: i32, %arg2: i32) -> (i32, i32, i32) {
    %c0_i32 = arith.constant 0 : i32
    %c0_i32_0 = arith.constant 0 : i32
    %c0_i32_1 = arith.constant 0 : i32
    return %c0_i32, %c0_i32_0, %arg2 : i32, i32, i32
  }
  func.func @transform_2(%arg0: i32, %arg1: i32, %arg2: i32) -> (i32, i32) {
    %c0_i32 = arith.constant 0 : i32
    %c0_i32_0 = arith.constant 0 : i32
    return %c0_i32, %arg2 : i32, i32
  }
  func.func @transform_3(%arg0: i32, %arg1: i32, %arg2: i32) -> (i32, i32, i32, i32, i32) {
    %c0_i32 = arith.constant 0 : i32
    %c0_i32_0 = arith.constant 0 : i32
    %c0_i32_1 = arith.constant 0 : i32
    return %arg0, %arg1, %c0_i32, %c0_i32_0, %arg2 : i32, i32, i32, i32, i32
  }
}

</mosaic_0001>

<bundles_post_ra>
// kernel: tpu_custom_call.1
= control target key start
LH: loop header
LB: loop body
LE: loop exit
PB: predicated region body
PF: predicated region fallthrough
CT: control target
= control target key end

     0   :  { %s4652_s12 = smov 0   ;;  %s4654_s13 = smov 0   ;;  %s5900_s0 = inlined_call_operand.vmem [shape: f32[2,1,18,18,4], index: 0, kind: input, shape index: {}]   ;;  %s5901_s1 = inlined_call_operand.vmem [shape: f32[9,4,8], index: 1, kind: input, shape index: {}]   ;;  %s5902_s2 = inlined_call_operand.vmem [shape: f32[1,8], index: 2, kind: input, shape index: {}]   ;;  %s5903_s3 = inlined_call_operand.vmem [shape: f32[2,1,16,16,8], index: 3, kind: output, shape index: {}]  }
   0x1   :  { %s4656_s14 = smov 0  }
   0x2 LB: > { %s32_s15 = sadd.s32 1, %s4626_s13  ;;  %p3265_p0 = scmp.ge.s32.totalorder %s4630_s14, 1  ;;  %s4630_s14 = sphi %s4656_s14, %s13_s14   ;;  %s4626_s13 = sphi %s4654_s13, %s6079_s13   ;;  %s4622_s12 = sphi %s4652_s12, %s6078_s12  }
   0x3   : > { %p34_p1 = scmp.ge.s32.totalorder %s32_s15, 2  ;;  %p183_p2 = scmp.lt.s32.totalorder %s4630_s14, 3 }
   0x5   : > { %s6081_s15 = smov (%p34_p1, %s32_s15), 0  ;;  %p184_p3 = pnand %p3265_p0, %p183_p2 }
   0x7   : > { %187 = sbr.rel (%p184_p3) target bundleno = 528 (0x210), region = 32 }
   0xe   : > { %v3269_v0 = vld [vmem:[%s5901_s1 + $0x4] sm:$0xf]  ;;  %vm504_vm0 = vcmask 1043456   ;;  %v4676_v1 = vld [vmem:[%s5901_s1 + $0x10] sm:$0xf]  ;;  %p225_p4 = scmp.lt.s32.totalorder %s4622_s12, 1 }
   0xf   : > { %3875 = vmatprep.subr.msk.mxu1 %vm504_vm0, %v3269_v0  ;;  %4075 = vmatprep.subr.msk.mxu0 %vm504_vm0, %v4676_v1  ;;  %v307_v2 = vld [vmem:[%s5901_s1] sm:$0xf]  ;;  %v3438_v3 = vld [vmem:[%s5901_s1 + $0x14] sm:$0xf]  ;;  %vm356_vm1 = vcmask 1046528   ;;  %vm439_vm2 = vcmask 31744  }
  0x10   : > { %3876 = vmatpush3.msk.msra.mxu1 %vm504_vm0, %v3269_v0  ;;  %4076 = vmatpush3.msk.msra.mxu0 %vm504_vm0, %v4676_v1  ;;  %s6083_s12 = smov (!%p225_p4, %s4622_s12), 1  ;;  %v4763_v33 = vld [vmem:[%s5901_s1 + $0x18] sm:$0xf]  ;;  %v4773_v35 = vld [vmem:[%s5901_s1 + $0x8] sm:$0xf]  ;;  %vm1025_vm3 = vcmask 1045504  }
  0x11   : > { %3925 = vmatprep.subr.msk.mxu1 %vm504_vm0, %v307_v2  ;;  %4125 = vmatprep.subr.msk.mxu0 %vm504_vm0, %v3438_v3  ;;  %s4583_s24 = smul.u32 432, %s6083_s12  ;;  %s3577_s11 = sshll.u32 %s6083_s12, 8  ;;  %vm3093_vm4 = vcmask 64512  }
  0x12   : > { %s5792_s20 = scalar_lea.vmem %s5903_s3, %s3577_s11 }
  0x13   : > { %s4698_s27 = scalar_lea.vmem %s5900_s0, %s4583_s24 }
  0x14   : > { %v4701_v4 = vld [vmem:[%s4698_s27] sm:$0xff]  ;;  %v4704_v5 = vld [vmem:[%s4698_s27 + $0x8] sm:$0xff]  ;;  %v4707_v6 = vld [vmem:[%s4698_s27 + $0x18] sm:$0xff] }
  0x15   : > { %5977 = vst [vmem:[#allocation2_spill] sm:$0xff] %v4707_v6  ;;  %v357_v7 = vrot.slane %v4701_v4, 1  ;;  %v358_v8 = vrot.slane %v4704_v5, 1  ;;  %v4712_v9 = vld [vmem:[%s4698_s27 + $0x20] sm:$0xff]  ;;  %v362_v10 = vrot.slane %v4707_v6, 1  ;;  %v4724_v15 = vld [vmem:[%s4698_s27 + $0x30] sm:$0xff] }
  0x16   : > { %5978 = vst [vmem:[#allocation3_spill] sm:$0xff] %v4712_v9  ;;  %v4716_v11 = vld [vmem:[%s4698_s27 + $0x10] sm:$0x3]  ;;  %v363_v12 = vrot.slane %v4712_v9, 1  ;;  %v4721_v14 = vld [vmem:[%s4698_s27 + $0x28] sm:$0x3] }
  0x17   : > { %v360_v13 = vrot.slane %v4716_v11, 1  ;;  %v359_v16 = vsel %vm356_vm1, %v357_v7, %v358_v8  ;;  %v365_v17 = vrot.slane %v4721_v14, 1  ;;  %v4729_v18 = vld [vmem:[%s4698_s27 + $0x38] sm:$0xff]  ;;  %v367_v19 = vrot.slane %v4724_v15, 1  ;;  %v4733_v20 = vld [vmem:[%s4698_s27 + $0x40] sm:$0x3] }
  0x18   : > { %3877 = vmatprep.mubr.msk.f32.mxu1 %vm439_vm2, %v359_v16  ;;  %v364_v21 = vsel %vm356_vm1, %v362_v10, %v363_v12  ;;  %v368_v23 = vrot.slane %v4729_v18, 1  ;;  %v370_v24 = vrot.slane %v4733_v20, 1  ;;  %v4741_v25 = vld [vmem:[%s4698_s27 + $0x48] sm:$0xff]  ;;  %v4744_v26 = vld [vmem:[%s4698_s27 + $0x50] sm:$0xff]  ;;  %v4747_v27 = vld [vmem:[%s4698_s27 + $0x58] sm:$0x3] }
  0x19   : > { %v361_v22 = vsel %vm356_vm1, %v358_v8, %v360_v13  ;;  %4077 = vmatprep.mubr.msk.f32.mxu0 %vm439_vm2, %v364_v21  ;;  %v366_v28 = vsel %vm356_vm1, %v363_v12, %v365_v17  ;;  %v372_v29 = vrot.slane %v4741_v25, 1  ;;  %v373_v30 = vrot.slane %v4744_v26, 1  ;;  %v4755_v31 = vld [vmem:[%s4698_s27 + $0x60] sm:$0xff]  ;;  %v4758_v32 = vld [vmem:[%s4698_s27 + $0x68] sm:$0xff]  ;;  %v4789_v41 = vld [vmem:[%s4698_s27 + $0x70] sm:$0x3] }
  0x1a   : > { %3878 = vmatmul.mubr.msk.f32.vlgmr.msra.gmra.mrb[0].mxu1 %vm439_vm2, %v361_v22  ;;  %4078 = vmatmul.mubr.msk.f32.vlgmr.msra.gmra.mrb[0].mxu0 %vm439_vm2, %v366_v28  ;;  %v4768_v34 = vsel %vm356_vm1, %v367_v19, %v368_v23  ;;  %v4778_v36 = vsel %vm356_vm1, %v368_v23, %v370_v24  ;;  %v375_v37 = vrot.slane %v4747_v27, 1  ;;  %v377_v39 = vrot.slane %v4755_v31, 1  ;;  %v4795_v42 = vld [vmem:[%s4698_s27 + $0x78] sm:$0xff]  ;;  %v4798_v43 = vld [vmem:[%s4698_s27 + $0x80] sm:$0xff]  ;;  %v4818_v49 = vld [vmem:[%s4698_s27 + $0x88] sm:$0x3] }
  0x1b   : > { %3926 = vmatpush3.msk.msra.mxu1 %vm504_vm0, %v307_v2  ;;  %5979 = vst [vmem:[#allocation4_spill] sm:$0xff] %v4768_v34  ;;  %4126 = vmatpush3.msk.msra.mxu0 %vm504_vm0, %v3438_v3  ;;  %5980 = vst [vmem:[#allocation5_spill] sm:$0xff] %v4778_v36  ;;  %v4784_v38 = vsel %vm356_vm1, %v372_v29, %v373_v30  ;;  %v378_v40 = vrot.slane %v4758_v32, 1  ;;  %v380_v45 = vrot.slane %v4789_v41, 1  ;;  %v382_v47 = vrot.slane %v4795_v42, 1  ;;  %v4823_v50 = vld [vmem:[%s4698_s27 + $0x90] sm:$0xff] }
  0x1c   : > { %3880 = vmatprep.mubr.msk.f32.mxu1 %vm439_vm2, %v364_v21  ;;  %4080 = vmatprep.mubr.msk.f32.mxu0 %vm439_vm2, %v4768_v34  ;;  %5981 = vst [vmem:[#allocation6_spill] sm:$0xff] %v4784_v38  ;;  %v4809_v44 = vsel %vm356_vm1, %v373_v30, %v375_v37  ;;  %v383_v48 = vrot.slane %v4798_v43, 1  ;;  %v4826_v51 = vld [vmem:[%s4698_s27 + $0x98] sm:$0xff]  ;;  %v385_v53 = vrot.slane %v4818_v49, 1  ;;  %v387_v55 = vrot.slane %v4823_v50, 1  ;;  %v4849_v58 = vld [vmem:[%s4698_s27 + $0xa8] sm:$0xff] }
  0x1d   : > { %4175 = vmatprep.subr.msk.mxu0 %vm504_vm0, %v4763_v33  ;;  %3975 = vmatprep.subr.msk.mxu1 %vm504_vm0, %v4773_v35  ;;  %5982 = vst [vmem:[#allocation7_spill] sm:$0xff] %v4809_v44  ;;  %v4813_v46 = vsel %vm356_vm1, %v377_v39, %v378_v40  ;;  %v4835_v52 = vsel %vm356_vm1, %v378_v40, %v380_v45  ;;  %v388_v56 = vrot.slane %v4826_v51, 1  ;;  %v4844_v57 = vld [vmem:[%s4698_s27 + $0xa0] sm:$0x3]  ;;  %v4852_v59 = vld [vmem:[%s4698_s27 + $0xb0] sm:$0xff]  ;;  %v392_v63 = vrot.slane %v4849_v58, 1 }
  0x1e   : > { %3881 = vmatmul.mubr.msk.f32.gmra.mrb[2].mxu1 %vm439_vm2, %v366_v28  ;;  %4081 = vmatmul.mubr.msk.f32.gmra.mrb[2].mxu0 %vm439_vm2, %v4778_v36  ;;  %5983 = vst [vmem:[#allocation8_spill] sm:$0xff] %v4813_v46  ;;  %5984 = vst [vmem:[#allocation9_spill] sm:$0xff] %v4835_v52  ;;  %v4839_v54 = vsel %vm356_vm1, %v382_v47, %v383_v48  ;;  %v4861_v60 = vsel %vm356_vm1, %v383_v48, %v385_v53  ;;  %v390_v61 = vrot.slane %v4844_v57, 1  ;;  %v4870_v2 = vld [vmem:[%s4698_s27 + $0xb8] sm:$0x3]  ;;  %v4875_v3 = vld [vmem:[%s4698_s27 + $0xc0] sm:$0xff] }
  0x1f   : > { %3883 = vmatprep.mubr.msk.f32.mxu1 %vm439_vm2, %v4768_v34  ;;  %4083 = vmatprep.mubr.msk.f32.mxu0 %vm439_vm2, %v4784_v38  ;;  %5985 = vst [vmem:[#allocation10_spill] sm:$0xff] %v4839_v54  ;;  %5986 = vst [vmem:[#allocation11_spill] sm:$0xff] %v4861_v60  ;;  %v4865_v62 = vsel %vm356_vm1, %v387_v55, %v388_v56  ;;  %v393_v0 = vrot.slane %v4852_v59, 1  ;;  %v4878_v7 = vld [vmem:[%s4698_s27 + $0xc8] sm:$0xff]  ;;  %v395_v10 = vrot.slane %v4870_v2, 1  ;;  %v397_v13 = vrot.slane %v4875_v3, 1 }
  0x20   : > { %5987 = vst [vmem:[#allocation12_spill] sm:$0xff] %v4865_v62  ;;  %v4887_v8 = vsel %vm356_vm1, %v388_v56, %v390_v61  ;;  %v398_v16 = vrot.slane %v4878_v7, 1  ;;  %v4896_v17 = vld [vmem:[%s4698_s27 + $0xd0] sm:$0x3]  ;;  %v1031_v23 = vrot.slane %v4707_v6, 2  ;;  %v1032_v24 = vrot.slane %v4712_v9, 2 }
  0x21   : > { %5988 = vst [vmem:[#allocation13_spill] sm:$0xff] %v4887_v8  ;;  %v4891_v12 = vsel %vm356_vm1, %v392_v63, %v393_v0  ;;  %v4907_v19 = vsel %vm356_vm1, %v393_v0, %v395_v10  ;;  %v400_v21 = vrot.slane %v4896_v17, 1  ;;  %v4916_v28 = vld [vmem:[%s4698_s27 + $0xd8] sm:$0xff]  ;;  %v4919_v29 = vld [vmem:[%s4698_s27 + $0xe0] sm:$0xff]  ;;  %v1034_v30 = vrot.slane %v4721_v14, 2  ;;  %v4944_v53 = vld [vmem:[%s4698_s27 + $0xf0] sm:$0xff] }
  0x22   : > { %3884 = vmatmul.mubr.msk.f32.gmra.mrb[4].mxu1 %vm439_vm2, %v4778_v36  ;;  %4084 = vmatmul.mubr.msk.f32.gmra.mrb[4].mxu0 %vm439_vm2, %v4809_v44  ;;  %5989 = vst [vmem:[#allocation14_spill] sm:$0xff] %v4891_v12  ;;  %5990 = vst [vmem:[#allocation15_spill] sm:$0xff] %v4907_v19  ;;  %v4911_v22 = vsel %vm356_vm1, %v397_v13, %v398_v16  ;;  %v402_v39 = vrot.slane %v4916_v28, 1  ;;  %v403_v40 = vrot.slane %v4919_v29, 1  ;;  %v4936_v45 = vld [vmem:[%s4698_s27 + $0xe8] sm:$0x3] }
  0x23   : > { %3886 = vmatprep.mubr.msk.f32.mxu1 %vm439_vm2, %v4784_v38  ;;  %4086 = vmatprep.mubr.msk.f32.mxu0 %vm439_vm2, %v4813_v46  ;;  %5991 = vst [vmem:[#allocation16_spill] sm:$0xff] %v4911_v22  ;;  %v4931_v37 = vsel %vm356_vm1, %v398_v16, %v400_v21  ;;  %v4939_v47 = vsel %vm1025_vm3, %v1031_v23, %v1032_v24  ;;  %v1036_v48 = vrot.slane %v4724_v15, 2  ;;  %v1037_v14 = vrot.slane %v4729_v18, 2  ;;  %v4947_v55 = vld [vmem:[%s4698_s27 + $0xf8] sm:$0xff]  ;;  %v4968_v16 = vld [vmem:[%s4698_s27 + $0x100] sm:$0x3] }
  0x24   : > { %5992 = vst [vmem:[#allocation17_spill] sm:$0xff] %v4931_v37  ;;  %v405_v56 = vrot.slane %v4936_v45, 1  ;;  %v1039_v61 = vrot.slane %v4733_v20, 2  ;;  %v4960_v63 = vsel %vm1025_vm3, %v1032_v24, %v1034_v30  ;;  %v4963_v0 = vsel %vm356_vm1, %v402_v39, %v403_v40  ;;  %v4979_v24 = vld [vmem:[%s4698_s27 + $0x110] sm:$0xff]  ;;  %v4986_v30 = vld [vmem:[%s5901_s1 + $0x1c] sm:$0xf] }
  0x25   : > { %5993 = vst [vmem:[#allocation18_spill] sm:$0xff] %v4963_v0  ;;  %v407_v10 = vrot.slane %v4944_v53, 1  ;;  %v408_v13 = vrot.slane %v4947_v55, 1  ;;  %v4971_v21 = vsel %vm1025_vm3, %v1036_v48, %v1037_v14  ;;  %v1041_v20 = vrot.slane %v4741_v25, 2  ;;  %v5082_v36 = vld [vmem:[%s4698_s27 + $0x148] sm:$0x3] }
  0x26   : > { %3887 = vmatmul.mubr.msk.f32.gmra.mrb[6].mxu1 %vm439_vm2, %v4809_v44  ;;  %4087 = vmatmul.mubr.msk.f32.gmra.mrb[6].mxu0 %vm439_vm2, %v4835_v52  ;;  %v1042_v23 = vrot.slane %v4744_v26, 2  ;;  %v4993_v39 = vsel %vm356_vm1, %v403_v40, %v405_v56  ;;  %v4996_v48 = vsel %vm1025_vm3, %v1037_v14, %v1039_v61  ;;  %v413_v40 = vrot.slane %v4979_v24, 1  ;;  %v5010_v56 = vld [vmem:[%s4698_s27 + $0x118] sm:$0x3] }
  0x27   : > { %3889 = vmatprep.mubr.msk.f32.mxu1 %vm439_vm2, %v4813_v46  ;;  %4089 = vmatprep.mubr.msk.f32.mxu0 %vm439_vm2, %v4839_v54  ;;  %5994 = vst [vmem:[#allocation19_spill] sm:$0xff] %v4993_v39  ;;  %5995 = vst [vmem:[#allocation20_spill] sm:$0xff] %v4996_v48  ;;  %v1046_v61 = vrot.slane %v4755_v31, 2  ;;  %v5055_v46 = vld [vmem:[%s4698_s27 + $0x138] sm:$0xff]  ;;  %v1054_v44 = vrot.slane %v4818_v49, 2  ;;  %v1059_v34 = vrot.slane %v4844_v57, 2 }
  0x28   : > { %v5013_v14 = vsel %vm1025_vm3, %v1041_v20, %v1042_v23  ;;  %v415_v20 = vrot.slane %v5010_v56, 1  ;;  %v422_v38 = vrot.slane %v5055_v46, 1  ;;  %v1061_v57 = vrot.slane %v4849_v58, 2 }
  0x29   : > { %5997 = vst [vmem:[#allocation22_spill] sm:$0xff] %v5013_v14 }
  0x2a   : > { %3890 = vmatmul.mubr.msk.f32.gmra.mrb[8].mxu1 %vm439_vm2, %v4835_v52  ;;  %4090 = vmatmul.mubr.msk.f32.gmra.mrb[8].mxu0 %vm439_vm2, %v4861_v60  ;;  %v5047_v52 = vld [vmem:[%s4698_s27 + $0x130] sm:$0x3] }
  0x2b   : > { %3892 = vmatprep.mubr.msk.f32.mxu1 %vm439_vm2, %v4839_v54  ;;  %4092 = vmatprep.mubr.msk.f32.mxu0 %vm439_vm2, %v4865_v62 }
  0x2e   : > { %3893 = vmatmul.mubr.msk.f32.gmra.mrb[10].mxu1 %vm439_vm2, %v4861_v60  ;;  %4093 = vmatmul.mubr.msk.f32.gmra.mrb[10].mxu0 %vm439_vm2, %v4887_v8 }
  0x2f   : > { %3895 = vmatprep.mubr.msk.f32.mxu1 %vm439_vm2, %v4865_v62  ;;  %4095 = vmatprep.mubr.msk.f32.mxu0 %vm439_vm2, %v4891_v12  ;;  %v1049_v62 = vrot.slane %v4789_v41, 2  ;;  %v1051_v41 = vrot.slane %v4795_v42, 2 }
  0x32   : > { %3896 = vmatmul.mubr.msk.f32.gmra.mrb[12].mxu1 %vm439_vm2, %v4887_v8  ;;  %4096 = vmatmul.mubr.msk.f32.gmra.mrb[12].mxu0 %vm439_vm2, %v4907_v19  ;;  %v5018_v8 = vld [vmem:[%s4698_s27 + $0x120] sm:$0xff] }
  0x33   : > { %3898 = vmatprep.mubr.msk.f32.mxu1 %vm439_vm2, %v4891_v12  ;;  %4098 = vmatprep.mubr.msk.f32.mxu0 %vm439_vm2, %v4911_v22  ;;  %v1044_v12 = vrot.slane %v4747_v27, 2  ;;  %v417_v54 = vrot.slane %v5018_v8, 1 }
  0x35   : > { %v5039_v60 = vsel %vm1025_vm3, %v1042_v23, %v1044_v12  ;;  %v5058_v12 = vld [vmem:[%s4698_s27 + $0x140] sm:$0xff] }
  0x36   : > { %3899 = vmatmul.mubr.msk.f32.gmra.mrb[14].mxu1 %vm439_vm2, %v4907_v19  ;;  %4099 = vmatmul.mubr.msk.f32.gmra.mrb[14].mxu0 %vm439_vm2, %v4931_v37  ;;  %v5004_v19 = vsel %vm356_vm1, %v407_v10, %v408_v13  ;;  %v5021_v10 = vld [vmem:[%s4698_s27 + $0x128] sm:$0xff]  ;;  %5999 = vst [vmem:[#allocation24_spill] sm:$0xff] %v5039_v60 }
  0x37   : > { %3901 = vmatprep.mubr.msk.f32.mxu1 %vm439_vm2, %v4911_v22  ;;  %4127 = vmatprep.mubr.msk.f32.mxu0 %vm439_vm2, %v4939_v47  ;;  %v4976_v22 = vld [vmem:[%s4698_s27 + $0x108] sm:$0xff]  ;;  %5996 = vst [vmem:[#allocation21_spill] sm:$0xff] %v5004_v19 }
  0x3a   : > { %3902 = vmatmul.mubr.msk.f32.gmra.mrb[16].mxu1 %vm439_vm2, %v4931_v37  ;;  %4128 = vmatmul.mubr.msk.f32.vlgmr.msra.gmra.mrb[0].mxu0 %vm439_vm2, %v4960_v63  ;;  %v410_v37 = vrot.slane %v4968_v16, 1 }
  0x3b   : > { %3904 = vmatprep.mubr.msk.f32.mxu1 %vm439_vm2, %v4963_v0  ;;  %4176 = vmatpush3.msk.msra.mxu0 %vm504_vm0, %v4763_v33  ;;  %v412_v0 = vrot.slane %v4976_v22, 1  ;;  %v1047_v33 = vrot.slane %v4758_v32, 2 }
  0x3c   : > { %4130 = vmatprep.mubr.msk.f32.mxu0 %vm439_vm2, %v4971_v21  ;;  %4225 = vmatprep.subr.msk.mxu0 %vm504_vm0, %v4986_v30  ;;  %v5032_v27 = vsel %vm356_vm1, %v408_v13, %v410_v37  ;;  %v1052_v13 = vrot.slane %v4798_v43, 2 }
  0x3d   : > { %5998 = vst [vmem:[#allocation23_spill] sm:$0xff] %v5032_v27  ;;  %v5050_v37 = vsel %vm1025_vm3, %v1046_v61, %v1047_v33  ;;  %v5070_v23 = vsel %vm1025_vm3, %v1047_v33, %v1049_v62  ;;  %v420_v61 = vrot.slane %v5047_v52, 1  ;;  %v1056_v62 = vrot.slane %v4823_v50, 2 }
  0x3e   : > { %3905 = vmatmul.mubr.msk.f32.gmra.mrb[18].mxu1 %vm439_vm2, %v4993_v39  ;;  %4131 = vmatmul.mubr.msk.f32.gmra.mrb[2].mxu0 %vm439_vm2, %v4996_v48  ;;  %v5042_v39 = vsel %vm356_vm1, %v412_v0, %v413_v40  ;;  %6001 = vst [vmem:[#allocation26_spill] sm:$0xff] %v5050_v37  ;;  %v5067_v0 = vsel %vm356_vm1, %v413_v40, %v415_v20  ;;  %6003 = vst [vmem:[#allocation28_spill] sm:$0xff] %v5070_v23  ;;  %v1057_v33 = vrot.slane %v4826_v51, 2  ;;  %v5090_v20 = vld [vmem:[%s4698_s27 + $0x150] sm:$0xff]  ;;  %v5152_v48 = vld [vmem:[%s4698_s27 + $0x178] sm:$0x3] }
  0x3f   : > { %3907 = vmatprep.mubr.msk.f32.mxu1 %vm439_vm2, %v5004_v19  ;;  %4133 = vmatprep.mubr.msk.f32.mxu0 %vm439_vm2, %v5013_v14  ;;  %6000 = vst [vmem:[#allocation25_spill] sm:$0xff] %v5042_v39  ;;  %v418_v19 = vrot.slane %v5021_v10, 1  ;;  %6002 = vst [vmem:[#allocation27_spill] sm:$0xff] %v5067_v0  ;;  %v5085_v40 = vsel %vm1025_vm3, %v1051_v41, %v1052_v13  ;;  %v425_v41 = vrot.slane %v5082_v36, 1 }
  0x40   : > { %6005 = vst [vmem:[#allocation30_spill] sm:$0xff] %v5085_v40 }
  0x41   : > { %v5102_v49 = vsel %vm356_vm1, %v418_v19, %v420_v61  ;;  %v1062_v61 = vrot.slane %v4852_v59, 2 }
  0x42   : > { %3908 = vmatmul.mubr.msk.f32.gmra.mrb[20].mxu1 %vm439_vm2, %v5032_v27  ;;  %4134 = vmatmul.mubr.msk.f32.gmra.mrb[4].mxu0 %vm439_vm2, %v5039_v60  ;;  %v5076_v27 = vsel %vm356_vm1, %v417_v54, %v418_v19  ;;  %v5093_v54 = vld [vmem:[%s4698_s27 + $0x158] sm:$0xff]  ;;  %6006 = vst [vmem:[#allocation31_spill] sm:$0xff] %v5102_v49  ;;  %v5117_v60 = vld [vmem:[%s4698_s27 + $0x160] sm:$0x3]  ;;  %v5120_v19 = vsel %vm1025_vm3, %v1056_v62, %v1057_v33 }
  0x43   : > { %3910 = vmatprep.mubr.msk.f32.mxu1 %vm439_vm2, %v5042_v39  ;;  %4136 = vmatprep.mubr.msk.f32.mxu0 %vm439_vm2, %v5050_v37  ;;  %6004 = vst [vmem:[#allocation29_spill] sm:$0xff] %v5076_v27  ;;  %v423_v39 = vrot.slane %v5058_v12, 1  ;;  %v5109_v37 = vsel %vm1025_vm3, %v1052_v13, %v1054_v44  ;;  %v5128_v44 = vld [vmem:[%s4698_s27 + $0x170] sm:$0xff]  ;;  %v5140_v13 = vsel %vm1025_vm3, %v1057_v33, %v1059_v34  ;;  %v430_v62 = vrot.slane %v5117_v60, 1 }
  0x44   : > { %6007 = vst [vmem:[#allocation32_spill] sm:$0xff] %v5109_v37  ;;  %6009 = vst [vmem:[#allocation34_spill] sm:$0xff] %v5128_v44  ;;  %v1066_v34 = vrot.slane %v4875_v3, 2  ;;  %v1067_v33 = vrot.slane %v4878_v7, 2 }
  0x45   : > { %6011 = vst [vmem:[#allocation36_spill] sm:$0xff] %v5140_v13 }
  0x46   : > { %3911 = vmatmul.mubr.msk.f32.gmra.mrb[22].mxu1 %vm439_vm2, %v5067_v0  ;;  %4137 = vmatmul.mubr.msk.f32.gmra.mrb[6].mxu0 %vm439_vm2, %v5070_v23  ;;  %v5112_v0 = vsel %vm356_vm1, %v422_v38, %v423_v39  ;;  %v427_v23 = vrot.slane %v5090_v20, 1  ;;  %v5137_v38 = vsel %vm356_vm1, %v423_v39, %v425_v41  ;;  %v5155_v39 = vsel %vm1025_vm3, %v1061_v57, %v1062_v61 }
  0x47   : > { %3913 = vmatprep.mubr.msk.f32.mxu1 %vm439_vm2, %v5076_v27  ;;  %4139 = vmatprep.mubr.msk.f32.mxu0 %vm439_vm2, %v5085_v40  ;;  %6008 = vst [vmem:[#allocation33_spill] sm:$0xff] %v5112_v0  ;;  %v428_v27 = vrot.slane %v5093_v54, 1  ;;  %v5125_v40 = vld [vmem:[%s4698_s27 + $0x168] sm:$0xff]  ;;  %6010 = vst [vmem:[#allocation35_spill] sm:$0xff] %v5137_v38 }
  0x49   : > { %v5146_v14 = vsel %vm356_vm1, %v427_v23, %v428_v27  ;;  %v435_v23 = vrot.slane %v5152_v48, 1 }
  0x4a   : > { %3914 = vmatmul.mubr.msk.f32.gmra.mrb[24].mxu1 %vm439_vm2, %v5102_v49  ;;  %4140 = vmatmul.mubr.msk.f32.gmra.mrb[8].mxu0 %vm439_vm2, %v5109_v37  ;;  %6012 = vst [vmem:[#allocation37_spill] sm:$0xff] %v5146_v14  ;;  %v1064_v49 = vrot.slane %v4870_v2, 2  ;;  %v432_v37 = vrot.slane %v5125_v40, 1  ;;  %v5166_v2 = vsel %vm356_vm1, %v428_v27, %v430_v62  ;;  %v1072_v27 = vrot.slane %v4919_v29, 2 }
  0x4b   : > { %3916 = vmatprep.mubr.msk.f32.mxu1 %vm439_vm2, %v5112_v0  ;;  %4142 = vmatprep.mubr.msk.f32.mxu0 %vm439_vm2, %v5120_v19  ;;  %v433_v0 = vrot.slane %v5128_v44, 1  ;;  %6013 = vst [vmem:[#allocation38_spill] sm:$0xff] %v5166_v2  ;;  %v1076_v62 = vrot.slane %v4944_v53, 2 }
  0x4c   : > { %v5172_v41 = vsel %vm1025_vm3, %v1062_v61, %v1064_v49  ;;  %v1074_v49 = vrot.slane %v4936_v45, 2 }
  0x4d   : > { %v5175_v57 = vsel %vm356_vm1, %v432_v37, %v433_v0  ;;  %v5190_v37 = vsel %vm356_vm1, %v433_v0, %v435_v23  ;;  %v5225_v23 = vld [vmem:[%s5901_s1 + $0xc] sm:$0xf] }
  0x4e   : > { %3917 = vmatmul.mubr.msk.f32.gmra.mrb[26].mxu1 %vm439_vm2, %v5137_v38  ;;  %4143 = vmatmul.mubr.msk.f32.gmra.mrb[10].mxu0 %vm439_vm2, %v5140_v13  ;;  %6014 = vst [vmem:[#allocation39_spill] sm:$0xff] %v5175_v57  ;;  %v1069_v38 = vrot.slane %v4896_v17, 2  ;;  %v5179_v13 = vsel %vm1025_vm3, %v1066_v34, %v1067_v33  ;;  %6015 = vst [vmem:[#allocation40_spill] sm:$0xff] %v5190_v37  ;;  %v1077_v34 = vrot.slane %v4947_v55, 2 }
  0x4f   : > { %3919 = vmatprep.mubr.msk.f32.mxu1 %vm439_vm2, %v5146_v14  ;;  %4145 = vmatprep.mubr.msk.f32.mxu0 %vm439_vm2, %v5155_v39  ;;  %v1071_v14 = vrot.slane %v4916_v28, 2  ;;  %v5212_v45 = vsel %vm1025_vm3, %v1072_v27, %v1074_v49 }
  0x50   : > { %v5195_v17 = vsel %vm1025_vm3, %v1067_v33, %v1069_v38  ;;  %v5216_v0 = vsel %vm1025_vm3, %v1076_v62, %v1077_v34  ;;  %v1081_v38 = vrot.slane %v4976_v22, 2  ;;  %v1082_v33 = vrot.slane %v4979_v24, 2 }
  0x51   : > { %v5199_v61 = vsel %vm1025_vm3, %v1071_v14, %v1072_v27  ;;  %v1079_v14 = vrot.slane %v4968_v16, 2  ;;  %v1084_v27 = vrot.slane %v5010_v56, 2  ;;  %v1086_v62 = vrot.slane %v5018_v8, 2 }
  0x52   : > { %3920 = vmatmul.mubr.msk.f32.gmra.mrb[28].mxu1 %vm439_vm2, %v5166_v2  ;;  %4146 = vmatmul.mubr.msk.f32.gmra.mrb[12].mxu0 %vm439_vm2, %v5172_v41  ;;  %v5240_v49 = vsel %vm1025_vm3, %v1081_v38, %v1082_v33  ;;  %v1091_v38 = vrot.slane %v5055_v46, 2  ;;  %v1102_v2 = vrot.slane %v5128_v44, 2 }
  0x53   : > { %3922 = vmatprep.mubr.msk.f32.mxu1 %vm439_vm2, %v5175_v57  ;;  %4148 = vmatprep.mubr.msk.f32.mxu0 %vm439_vm2, %v5179_v13  ;;  %v5236_v16 = vsel %vm1025_vm3, %v1077_v34, %v1079_v14  ;;  %6016 = vst [vmem:[#allocation41_spill] sm:$0xff] %v5240_v49  ;;  %v5255_v56 = vsel %vm1025_vm3, %v1082_v33, %v1084_v27  ;;  %v1089_v34 = vrot.slane %v5047_v52, 2  ;;  %v1094_v33 = vrot.slane %v5082_v36, 2 }
  0x54   : > { %v1097_v57 = vrot.slane %v5093_v54, 2 }
  0x56   : > { %3923 = vmatmul.mubr.msk.f32.gmra.mrb[30].mxu1 %vm439_vm2, %v5190_v37  ;;  %4149 = vmatmul.mubr.msk.f32.gmra.mrb[14].mxu0 %vm439_vm2, %v5195_v17  ;;  %v1092_v37 = vrot.slane %v5058_v12, 2 }
  0x57   : > { %3927 = vmatprep.mubr.msk.f32.mxu1 %vm439_vm2, %v4701_v4  ;;  %4151 = vmatprep.mubr.msk.f32.mxu0 %vm439_vm2, %v5199_v61 }
  0x58   : > { %v5276_v27 = vsel %vm1025_vm3, %v1091_v38, %v1092_v37  ;;  %v5289_v36 = vsel %vm1025_vm3, %v1092_v37, %v1094_v33  ;;  %v1101_v38 = vrot.slane %v5125_v40, 2  ;;  %v1104_v37 = vrot.slane %v5152_v48, 2 }
  0x59   : > { %6018 = vst [vmem:[#allocation43_spill] sm:$0xff] %v5276_v27  ;;  %6019 = vst [vmem:[#allocation44_spill] sm:$0xff] %v5289_v36 }
  0x5a   : > { %3928 = vmatmul.mubr.msk.f32.vlgmr.msra.gmra.mrb[0].mxu1 %vm439_vm2, %v4704_v5  ;;  %4152 = vmatmul.mubr.msk.f32.gmra.mrb[16].mxu0 %vm439_vm2, %v5212_v45  ;;  %v5316_v33 = vsel %vm1025_vm3, %v1101_v38, %v1102_v2  ;;  %v5332_v48 = vsel %vm1025_vm3, %v1102_v2, %v1104_v37  ;;  %v1027_v38 = vrot.slane %v4704_v5, 2  ;;  %v1029_v37 = vrot.slane %v4716_v11, 2  ;;  %v6026_v5 = vld [vmem:[#allocation20_spill] sm:$0xff]  ;;  %v6027_v11 = vld [vmem:[#allocation22_spill] sm:$0xff] }
  0x5b   : > { %3976 = vmatpush3.msk.msra.mxu1 %vm504_vm0, %v4773_v35  ;;  %3930 = vmatprep.mubr.msk.f32.mxu1 %vm439_vm2, %v4707_v6  ;;  %v1087_v35 = vrot.slane %v5021_v10, 2  ;;  %v5303_v6 = vld [vmem:[%s4698_s27 + $0x188] sm:$0xff]  ;;  %6022 = vst [vmem:[#allocation47_spill] sm:$0xff] %v5316_v33  ;;  %6023 = vst [vmem:[#allocation48_spill] sm:$0xff] %v5332_v48 }
  0x5c   : > { %4154 = vmatprep.mubr.msk.f32.mxu0 %vm439_vm2, %v5216_v0  ;;  %4025 = vmatprep.subr.msk.mxu1 %vm504_vm0, %v5225_v23 }
  0x5d   : > { %v5259_v14 = vsel %vm1025_vm3, %v1086_v62, %v1087_v35  ;;  %v5272_v52 = vsel %vm1025_vm3, %v1087_v35, %v1089_v34  ;;  %v1096_v62 = vrot.slane %v5090_v20, 2  ;;  %v1099_v35 = vrot.slane %v5117_v60, 2 }
  0x5e   : > { %3931 = vmatmul.mubr.msk.f32.gmra.mrb[2].mxu1 %vm439_vm2, %v4712_v9  ;;  %4155 = vmatmul.mubr.msk.f32.gmra.mrb[18].mxu0 %vm439_vm2, %v5236_v16  ;;  %6017 = vst [vmem:[#allocation42_spill] sm:$0xff] %v5272_v52  ;;  %v5300_v9 = vld [vmem:[%s4698_s27 + $0x180] sm:$0xff] }
  0x5f   : > { %3933 = vmatprep.mubr.msk.f32.mxu1 %vm439_vm2, %v4724_v15  ;;  %4157 = vmatprep.mubr.msk.f32.mxu0 %vm439_vm2, %v5240_v49  ;;  %v5293_v34 = vsel %vm1025_vm3, %v1096_v62, %v1097_v57  ;;  %v5312_v60 = vsel %vm1025_vm3, %v1097_v57, %v1099_v35  ;;  %v1972_v62 = vrot.slane %v5300_v9, 2 }
  0x60   : > { %6020 = vst [vmem:[#allocation45_spill] sm:$0xff] %v5293_v34  ;;  %6021 = vst [vmem:[#allocation46_spill] sm:$0xff] %v5312_v60 }
  0x62   : > { %3934 = vmatmul.mubr.msk.f32.gmra.mrb[4].mxu1 %vm439_vm2, %v4729_v18  ;;  %4158 = vmatmul.mubr.msk.f32.gmra.mrb[20].mxu0 %vm439_vm2, %v5255_v56 }
  0x63   : > { %3936 = vmatprep.mubr.msk.f32.mxu1 %vm439_vm2, %v4741_v25  ;;  %4160 = vmatprep.mubr.msk.f32.mxu0 %vm439_vm2, %v5259_v14 }
  0x66   : > { %3937 = vmatmul.mubr.msk.f32.gmra.mrb[6].mxu1 %vm439_vm2, %v4744_v26  ;;  %4161 = vmatmul.mubr.msk.f32.gmra.mrb[22].mxu0 %vm439_vm2, %v5272_v52  ;;  %v5321_v52 = vld [vmem:[%s4698_s27 + $0x190] sm:$0x3] }
  0x67   : > { %3939 = vmatprep.mubr.msk.f32.mxu1 %vm439_vm2, %v4755_v31  ;;  %4163 = vmatprep.mubr.msk.f32.mxu0 %vm439_vm2, %v5276_v27  ;;  %v1973_v27 = vrot.slane %v5303_v6, 2  ;;  %v1975_v57 = vrot.slane %v5321_v52, 2 }
  0x69   : > { %v5336_v35 = vsel %vm1025_vm3, %v1972_v62, %v1973_v27  ;;  %v5347_v2 = vsel %vm1025_vm3, %v1973_v27, %v1975_v57  ;;  %v5362_v27 = vld [vmem:[%s5901_s1 + $0x20] sm:$0xf] }
  0x6a   : > { %3940 = vmatmul.mubr.msk.f32.gmra.mrb[8].mxu1 %vm439_vm2, %v4758_v32  ;;  %4164 = vmatmul.mubr.msk.f32.gmra.mrb[24].mxu0 %vm439_vm2, %v5289_v36  ;;  %6024 = vst [vmem:[#allocation49_spill] sm:$0xff] %v5336_v35  ;;  %6025 = vst [vmem:[#allocation50_spill] sm:$0xff] %v5347_v2  ;;  %v6031_v57 = vld [vmem:[#allocation30_spill] sm:$0xff] }
  0x6b   : > { %3942 = vmatprep.mubr.msk.f32.mxu1 %vm439_vm2, %v4795_v42  ;;  %4166 = vmatprep.mubr.msk.f32.mxu0 %vm439_vm2, %v5293_v34 }
  0x6e   : > { %3943 = vmatmul.mubr.msk.f32.gmra.mrb[10].mxu1 %vm439_vm2, %v4798_v43  ;;  %4167 = vmatmul.mubr.msk.f32.gmra.mrb[26].mxu0 %vm439_vm2, %v5312_v60 }
  0x6f   : > { %3945 = vmatprep.mubr.msk.f32.mxu1 %vm439_vm2, %v4823_v50  ;;  %4169 = vmatprep.mubr.msk.f32.mxu0 %vm439_vm2, %v5316_v33 }
  0x72   : > { %3946 = vmatmul.mubr.msk.f32.gmra.mrb[12].mxu1 %vm439_vm2, %v4826_v51  ;;  %4170 = vmatmul.mubr.msk.f32.gmra.mrb[28].mxu0 %vm439_vm2, %v5332_v48 }
  0x73   : > { %3948 = vmatprep.mubr.msk.f32.mxu1 %vm439_vm2, %v4849_v58  ;;  %4172 = vmatprep.mubr.msk.f32.mxu0 %vm439_vm2, %v5336_v35  ;;  %v6036_v35 = vld [vmem:[#allocation6_spill] sm:$0xff] }
  0x76   : > { %3949 = vmatmul.mubr.msk.f32.gmra.mrb[14].mxu1 %vm439_vm2, %v4852_v59  ;;  %4173 = vmatmul.mubr.msk.f32.gmra.mrb[30].mxu0 %vm439_vm2, %v5347_v2  ;;  %v6035_v2 = vld [vmem:[#allocation5_spill] sm:$0xff] }
  0x77   : > { %3951 = vmatprep.mubr.msk.f32.mxu1 %vm439_vm2, %v4875_v3  ;;  %4177 = vmatprep.mubr.msk.f32.mxu0 %vm439_vm2, %v4724_v15 }
  0x7a   : > { %3952 = vmatmul.mubr.msk.f32.gmra.mrb[16].mxu1 %vm439_vm2, %v4878_v7  ;;  %4178 = vmatmul.mubr.msk.f32.vlgmr.msra.gmra.mrb[0].mxu0 %vm439_vm2, %v4729_v18 }
  0x7b   : > { %3954 = vmatprep.mubr.msk.f32.mxu1 %vm439_vm2, %v4916_v28  ;;  %4226 = vmatpush3.msk.msra.mxu0 %vm504_vm0, %v4986_v30  ;;  %v1026_v30 = vrot.slane %v4701_v4, 2  ;;  %v1030_v4 = vsel %vm1025_vm3, %v1027_v38, %v1029_v37  ;;  %v6033_v37 = vld [vmem:[#allocation36_spill] sm:$0xff] }
  0x7c   : > { %4180 = vmatprep.mubr.msk.f32.mxu0 %vm439_vm2, %v4741_v25  ;;  %4275 = vmatprep.subr.msk.mxu0 %vm504_vm0, %v5362_v27 }
  0x7d   : > { %v1028_v62 = vsel %vm1025_vm3, %v1026_v30, %v1027_v38  ;;  %v6032_v30 = vld [vmem:[#allocation32_spill] sm:$0xff]  ;;  %v5486_v38 = vld [vmem:[%s4698_s27 + $0x198] sm:$0xff] }
  0x7e   : > { %3955 = vmatmul.mubr.msk.f32.gmra.mrb[18].mxu1 %vm439_vm2, %v4919_v29  ;;  %4181 = vmatmul.mubr.msk.f32.gmra.mrb[2].mxu0 %vm439_vm2, %v4744_v26 }
  0x7f   : > { %3957 = vmatprep.mubr.msk.f32.mxu1 %vm439_vm2, %v4944_v53  ;;  %4183 = vmatprep.mubr.msk.f32.mxu0 %vm439_vm2, %v4755_v31 }
  0x82   : > { %3958 = vmatmul.mubr.msk.f32.gmra.mrb[20].mxu1 %vm439_vm2, %v4947_v55  ;;  %4184 = vmatmul.mubr.msk.f32.gmra.mrb[4].mxu0 %vm439_vm2, %v4758_v32 }
  0x83   : > { %3960 = vmatprep.mubr.msk.f32.mxu1 %vm439_vm2, %v4976_v22  ;;  %4186 = vmatprep.mubr.msk.f32.mxu0 %vm439_vm2, %v4795_v42 }
  0x86   : > { %3961 = vmatmul.mubr.msk.f32.gmra.mrb[22].mxu1 %vm439_vm2, %v4979_v24  ;;  %4187 = vmatmul.mubr.msk.f32.gmra.mrb[6].mxu0 %vm439_vm2, %v4798_v43 }
  0x87   : > { %3963 = vmatprep.mubr.msk.f32.mxu1 %vm439_vm2, %v5018_v8  ;;  %4189 = vmatprep.mubr.msk.f32.mxu0 %vm439_vm2, %v4823_v50 }
  0x8a   : > { %3964 = vmatmul.mubr.msk.f32.gmra.mrb[24].mxu1 %vm439_vm2, %v5021_v10  ;;  %4190 = vmatmul.mubr.msk.f32.gmra.mrb[8].mxu0 %vm439_vm2, %v4826_v51 }
  0x8b   : > { %3966 = vmatprep.mubr.msk.f32.mxu1 %vm439_vm2, %v5055_v46  ;;  %4192 = vmatprep.mubr.msk.f32.mxu0 %vm439_vm2, %v4849_v58 }
  0x8e   : > { %3967 = vmatmul.mubr.msk.f32.gmra.mrb[26].mxu1 %vm439_vm2, %v5058_v12  ;;  %4193 = vmatmul.mubr.msk.f32.gmra.mrb[10].mxu0 %vm439_vm2, %v4852_v59 }
  0x8f   : > { %3969 = vmatprep.mubr.msk.f32.mxu1 %vm439_vm2, %v5090_v20  ;;  %4195 = vmatprep.mubr.msk.f32.mxu0 %vm439_vm2, %v4875_v3 }
  0x92   : > { %3970 = vmatmul.mubr.msk.f32.gmra.mrb[28].mxu1 %vm439_vm2, %v5093_v54  ;;  %4196 = vmatmul.mubr.msk.f32.gmra.mrb[12].mxu0 %vm439_vm2, %v4878_v7 }
  0x93   : > { %3972 = vmatprep.mubr.msk.f32.mxu1 %vm439_vm2, %v5125_v40  ;;  %4198 = vmatprep.mubr.msk.f32.mxu0 %vm439_vm2, %v4916_v28 }
  0x96   : > { %3973 = vmatmul.mubr.msk.f32.gmra.mrb[30].mxu1 %vm439_vm2, %v5128_v44  ;;  %4199 = vmatmul.mubr.msk.f32.gmra.mrb[14].mxu0 %vm439_vm2, %v4919_v29 }
  0x97   : > { %3977 = vmatprep.mubr.msk.f32.mxu1 %vm439_vm2, %v1028_v62  ;;  %4201 = vmatprep.mubr.msk.f32.mxu0 %vm439_vm2, %v4944_v53  ;;  %v5497_v62 = vld [vmem:[%s4698_s27 + $0x1a0] sm:$0xff] }
  0x9a   : > { %3978 = vmatmul.mubr.msk.f32.vlgmr.msra.gmra.mrb[0].mxu1 %vm439_vm2, %v1030_v4  ;;  %4202 = vmatmul.mubr.msk.f32.gmra.mrb[16].mxu0 %vm439_vm2, %v4947_v55  ;;  %v6034_v4 = vld [vmem:[#allocation4_spill] sm:$0xff] }
  0x9b   : > { %4026 = vmatpush3.msk.msra.mxu1 %vm504_vm0, %v5225_v23  ;;  %3980 = vmatprep.mubr.msk.f32.mxu1 %vm439_vm2, %v4939_v47  ;;  %v6028_v47 = vld [vmem:[#allocation24_spill] sm:$0xff] }
  0x9c   : > { %4204 = vmatprep.mubr.msk.f32.mxu0 %vm439_vm2, %v4976_v22  ;;  %4325 = vmatprep.subr.msk.mxu1 %vm504_vm0, %v4676_v1  ;;  %v6030_v23 = vld [vmem:[#allocation28_spill] sm:$0xff] }
  0x9e   : > { %3981 = vmatmul.mubr.msk.f32.gmra.mrb[2].mxu1 %vm439_vm2, %v4960_v63  ;;  %4205 = vmatmul.mubr.msk.f32.gmra.mrb[18].mxu0 %vm439_vm2, %v4979_v24  ;;  %v6029_v63 = vld [vmem:[#allocation26_spill] sm:$0xff] }
  0x9f   : > { %3983 = vmatprep.mubr.msk.f32.mxu1 %vm439_vm2, %v4971_v21  ;;  %4207 = vmatprep.mubr.msk.f32.mxu0 %vm439_vm2, %v5018_v8 }
  0xa2   : > { %3984 = vmatmul.mubr.msk.f32.gmra.mrb[4].mxu1 %vm439_vm2, %v6026_v5  ;;  %4208 = vmatmul.mubr.msk.f32.gmra.mrb[20].mxu0 %vm439_vm2, %v5021_v10 }
  0xa3   : > { %3986 = vmatprep.mubr.msk.f32.mxu1 %vm439_vm2, %v6027_v11  ;;  %4210 = vmatprep.mubr.msk.f32.mxu0 %vm439_vm2, %v5055_v46 }
  0xa6   : > { %3987 = vmatmul.mubr.msk.f32.gmra.mrb[6].mxu1 %vm439_vm2, %v6028_v47  ;;  %4211 = vmatmul.mubr.msk.f32.gmra.mrb[22].mxu0 %vm439_vm2, %v5058_v12 }
  0xa7   : > { %3989 = vmatprep.mubr.msk.f32.mxu1 %vm439_vm2, %v6029_v63  ;;  %4213 = vmatprep.mubr.msk.f32.mxu0 %vm439_vm2, %v5090_v20 }
  0xaa   : > { %3990 = vmatmul.mubr.msk.f32.gmra.mrb[8].mxu1 %vm439_vm2, %v6030_v23  ;;  %4214 = vmatmul.mubr.msk.f32.gmra.mrb[24].mxu0 %vm439_vm2, %v5093_v54 }
  0xab   : > { %3992 = vmatprep.mubr.msk.f32.mxu1 %vm439_vm2, %v6031_v57  ;;  %4216 = vmatprep.mubr.msk.f32.mxu0 %vm439_vm2, %v5125_v40 }
  0xae   : > { %3993 = vmatmul.mubr.msk.f32.gmra.mrb[10].mxu1 %vm439_vm2, %v6032_v30  ;;  %4217 = vmatmul.mubr.msk.f32.gmra.mrb[26].mxu0 %vm439_vm2, %v5128_v44  ;;  %v6037_v44 = vld [vmem:[#allocation7_spill] sm:$0xff] }
  0xaf   : > { %3995 = vmatprep.mubr.msk.f32.mxu1 %vm439_vm2, %v5120_v19  ;;  %4219 = vmatprep.mubr.msk.f32.mxu0 %vm439_vm2, %v5300_v9 }
  0xb2   : > { %3996 = vmatmul.mubr.msk.f32.gmra.mrb[12].mxu1 %vm439_vm2, %v6033_v37  ;;  %4220 = vmatmul.mubr.msk.f32.gmra.mrb[28].mxu0 %vm439_vm2, %v5303_v6 }
  0xb3   : > { %3998 = vmatprep.mubr.msk.f32.mxu1 %vm439_vm2, %v5155_v39  ;;  %4222 = vmatprep.mubr.msk.f32.mxu0 %vm439_vm2, %v5486_v38 }
  0xb6   : > { %3999 = vmatmul.mubr.msk.f32.gmra.mrb[14].mxu1 %vm439_vm2, %v5172_v41  ;;  %4223 = vmatmul.mubr.msk.f32.gmra.mrb[30].mxu0 %vm439_vm2, %v5497_v62 }
  0xb7   : > { %4001 = vmatprep.mubr.msk.f32.mxu1 %vm439_vm2, %v5179_v13  ;;  %4227 = vmatprep.mubr.msk.f32.mxu0 %vm439_vm2, %v6034_v4  ;;  %v6038_v4 = vld [vmem:[#allocation8_spill] sm:$0xff] }
  0xba   : > { %4002 = vmatmul.mubr.msk.f32.gmra.mrb[16].mxu1 %vm439_vm2, %v5195_v17  ;;  %4228 = vmatmul.mubr.msk.f32.vlgmr.msra.gmra.mrb[0].mxu0 %vm439_vm2, %v6035_v2  ;;  %v6039_v2 = vld [vmem:[#allocation9_spill] sm:$0xff] }
  0xbb   : > { %4004 = vmatprep.mubr.msk.f32.mxu1 %vm439_vm2, %v5199_v61  ;;  %4276 = vmatpush3.msk.msra.mxu0 %vm504_vm0, %v5362_v27  ;;  %v6042_v27 = vld [vmem:[#allocation12_spill] sm:$0xff] }
  0xbc   : > { %4230 = vmatprep.mubr.msk.f32.mxu0 %vm439_vm2, %v6036_v35  ;;  %v6040_v35 = vld [vmem:[#allocation10_spill] sm:$0xff] }
  0xbe   : > { %4005 = vmatmul.mubr.msk.f32.gmra.mrb[18].mxu1 %vm439_vm2, %v5212_v45  ;;  %4231 = vmatmul.mubr.msk.f32.gmra.mrb[2].mxu0 %vm439_vm2, %v6037_v44  ;;  %v6041_v44 = vld [vmem:[#allocation11_spill] sm:$0xff] }
  0xbf   : > { %4007 = vmatprep.mubr.msk.f32.mxu1 %vm439_vm2, %v5216_v0  ;;  %4233 = vmatprep.mubr.msk.f32.mxu0 %vm439_vm2, %v6038_v4  ;;  %v6043_v4 = vld [vmem:[#allocation42_spill] sm:$0xff] }
  0xc2   : > { %4008 = vmatmul.mubr.msk.f32.gmra.mrb[20].mxu1 %vm439_vm2, %v5236_v16  ;;  %4234 = vmatmul.mubr.msk.f32.gmra.mrb[4].mxu0 %vm439_vm2, %v6039_v2  ;;  %v6044_v2 = vld [vmem:[#allocation13_spill] sm:$0xff] }
  0xc3   : > { %4010 = vmatprep.mubr.msk.f32.mxu1 %vm439_vm2, %v5240_v49  ;;  %4236 = vmatprep.mubr.msk.f32.mxu0 %vm439_vm2, %v6040_v35  ;;  %v6045_v49 = vld [vmem:[#allocation43_spill] sm:$0xff]  ;;  %v6046_v35 = vld [vmem:[#allocation14_spill] sm:$0xff] }
  0xc6   : > { %4011 = vmatmul.mubr.msk.f32.gmra.mrb[22].mxu1 %vm439_vm2, %v5255_v56  ;;  %4237 = vmatmul.mubr.msk.f32.gmra.mrb[6].mxu0 %vm439_vm2, %v6041_v44  ;;  %v6047_v44 = vld [vmem:[#allocation15_spill] sm:$0xff] }
  0xc7   : > { %4013 = vmatprep.mubr.msk.f32.mxu1 %vm439_vm2, %v5259_v14  ;;  %4239 = vmatprep.mubr.msk.f32.mxu0 %vm439_vm2, %v6042_v27  ;;  %v6048_v27 = vld [vmem:[#allocation16_spill] sm:$0xff] }
  0xca   : > { %4014 = vmatmul.mubr.msk.f32.gmra.mrb[24].mxu1 %vm439_vm2, %v6043_v4  ;;  %4240 = vmatmul.mubr.msk.f32.gmra.mrb[8].mxu0 %vm439_vm2, %v6044_v2  ;;  %v6049_v2 = vld [vmem:[#allocation17_spill] sm:$0xff] }
  0xcb   : > { %4016 = vmatprep.mubr.msk.f32.mxu1 %vm439_vm2, %v6045_v49  ;;  %4242 = vmatprep.mubr.msk.f32.mxu0 %vm439_vm2, %v6046_v35  ;;  %v6050_v35 = vld [vmem:[#allocation18_spill] sm:$0xff] }
  0xce   : > { %4017 = vmatmul.mubr.msk.f32.gmra.mrb[26].mxu1 %vm439_vm2, %v5289_v36  ;;  %4243 = vmatmul.mubr.msk.f32.gmra.mrb[10].mxu0 %vm439_vm2, %v6047_v44  ;;  %v6051_v44 = vld [vmem:[#allocation19_spill] sm:$0xff] }
  0xcf   : > { %4019 = vmatprep.mubr.msk.f32.mxu1 %vm439_vm2, %v5293_v34  ;;  %4245 = vmatprep.mubr.msk.f32.mxu0 %vm439_vm2, %v6048_v27  ;;  %v6052_v34 = vld [vmem:[#allocation2_spill] sm:$0xff]  ;;  %v6053_v27 = vld [vmem:[#allocation21_spill] sm:$0xff]  ;;  %v5624_v36 = vld [vmem:[%s4698_s27 + $0x1a8] sm:$0x3] }
  0xd2   : > { %4020 = vmatmul.mubr.msk.f32.gmra.mrb[28].mxu1 %vm439_vm2, %v5312_v60  ;;  %4246 = vmatmul.mubr.msk.f32.gmra.mrb[12].mxu0 %vm439_vm2, %v6049_v2  ;;  %v6054_v60 = vld [vmem:[#allocation3_spill] sm:$0xff] }
  0xd3   : > { %4022 = vmatprep.mubr.msk.f32.mxu1 %vm439_vm2, %v5316_v33  ;;  %4248 = vmatprep.mubr.msk.f32.mxu0 %vm439_vm2, %v6050_v35  ;;  %v6055_v2 = vld [vmem:[#allocation23_spill] sm:$0xff]  ;;  %v6063_v33 = vld [vmem:[#allocation38_spill] sm:$0xff] }
  0xd6   : > { %4023 = vmatmul.mubr.msk.f32.gmra.mrb[30].mxu1 %vm439_vm2, %v5332_v48  ;;  %4249 = vmatmul.mubr.msk.f32.gmra.mrb[14].mxu0 %vm439_vm2, %v6051_v44  ;;  %v6056_v48 = vld [vmem:[#allocation25_spill] sm:$0xff] }
  0xd7   : > { %4027 = vmatprep.mubr.msk.f32.mxu1 %vm439_vm2, %v6052_v34  ;;  %4251 = vmatprep.mubr.msk.f32.mxu0 %vm439_vm2, %v6053_v27  ;;  %v6057_v34 = vld [vmem:[#allocation27_spill] sm:$0xff] }
  0xda   : > { %4028 = vmatmul.mubr.msk.f32.vlgmr.msra.gmra.mrb[0].mxu1 %vm439_vm2, %v6054_v60  ;;  %4252 = vmatmul.mubr.msk.f32.gmra.mrb[16].mxu0 %vm439_vm2, %v6055_v2  ;;  %v6058_v60 = vld [vmem:[#allocation29_spill] sm:$0xff] }
  0xdb   : > { %4326 = vmatpush3.msk.msra.mxu1 %vm504_vm0, %v4676_v1  ;;  %4030 = vmatprep.mubr.msk.f32.mxu1 %vm439_vm2, %v4724_v15  ;;  %v6059_v1 = vld [vmem:[#allocation31_spill] sm:$0xff]  ;;  %v6060_v15 = vld [vmem:[#allocation33_spill] sm:$0xff] }
  0xdc   : > { %4254 = vmatprep.mubr.msk.f32.mxu0 %vm439_vm2, %v6056_v48 }
  0xde   : > { %4031 = vmatmul.mubr.msk.f32.gmra.mrb[2].mxu1 %vm439_vm2, %v4729_v18  ;;  %4255 = vmatmul.mubr.msk.f32.gmra.mrb[18].mxu0 %vm439_vm2, %v6057_v34  ;;  %v6061_v18 = vld [vmem:[#allocation35_spill] sm:$0xff] }
  0xdf   : > { %4033 = vmatprep.mubr.msk.f32.mxu1 %vm439_vm2, %v4741_v25  ;;  %4257 = vmatprep.mubr.msk.f32.mxu0 %vm439_vm2, %v6058_v60  ;;  %v6062_v25 = vld [vmem:[#allocation37_spill] sm:$0xff] }
  0xe2   : > { %4034 = vmatmul.mubr.msk.f32.gmra.mrb[4].mxu1 %vm439_vm2, %v4744_v26  ;;  %4258 = vmatmul.mubr.msk.f32.gmra.mrb[20].mxu0 %vm439_vm2, %v6059_v1  ;;  %v1701_v26 = vrot.slane %v5300_v9, 1 }
  0xe3   : > { %4036 = vmatprep.mubr.msk.f32.mxu1 %vm439_vm2, %v4755_v31  ;;  %4260 = vmatprep.mubr.msk.f32.mxu0 %vm439_vm2, %v6060_v15  ;;  %v1702_v31 = vrot.slane %v5303_v6, 1 }
  0xe5   : > { %v5621_v15 = vsel %vm356_vm1, %v1701_v26, %v1702_v31 }
  0xe6   : > { %4037 = vmatmul.mubr.msk.f32.gmra.mrb[6].mxu1 %vm439_vm2, %v4758_v32  ;;  %4261 = vmatmul.mubr.msk.f32.gmra.mrb[22].mxu0 %vm439_vm2, %v6061_v18  ;;  %v6064_v32 = vld [vmem:[#allocation39_spill] sm:$0xff]  ;;  %v2513_v18 = vrot.slane %v5497_v62, 1 }
  0xe7   : > { %4039 = vmatprep.mubr.msk.f32.mxu1 %vm439_vm2, %v4795_v42  ;;  %4263 = vmatprep.mubr.msk.f32.mxu0 %vm439_vm2, %v6062_v25  ;;  %v1704_v42 = vrot.slane %v5321_v52, 1  ;;  %v2512_v25 = vrot.slane %v5486_v38, 1  ;;  %v2515_v52 = vrot.slane %v5624_v36, 1 }
  0xe9   : > { %v2514_v26 = vsel %vm356_vm1, %v2512_v25, %v2513_v18 }
  0xea   : > { %4040 = vmatmul.mubr.msk.f32.gmra.mrb[8].mxu1 %vm439_vm2, %v4798_v43  ;;  %4264 = vmatmul.mubr.msk.f32.gmra.mrb[24].mxu0 %vm439_vm2, %v6063_v33  ;;  %v6065_v43 = vld [vmem:[#allocation40_spill] sm:$0xff] }
  0xeb   : > { %4042 = vmatprep.mubr.msk.f32.mxu1 %vm439_vm2, %v4823_v50  ;;  %4266 = vmatprep.mubr.msk.f32.mxu0 %vm439_vm2, %v6064_v32  ;;  %v5635_v50 = vsel %vm356_vm1, %v1702_v31, %v1704_v42 }
  0xee   : > { %4043 = vmatmul.mubr.msk.f32.gmra.mrb[10].mxu1 %vm439_vm2, %v4826_v51  ;;  %4267 = vmatmul.mubr.msk.f32.gmra.mrb[26].mxu0 %vm439_vm2, %v6065_v43  ;;  %v2516_v51 = vsel %vm356_vm1, %v2513_v18, %v2515_v52 }
  0xef   : > { %4045 = vmatprep.mubr.msk.f32.mxu1 %vm439_vm2, %v4849_v58  ;;  %4269 = vmatprep.mubr.msk.f32.mxu0 %vm439_vm2, %v5621_v15  ;;  %v6069_v58 = vld [vmem:[#allocation33_spill] sm:$0xff] }
  0xf2   : > { %4046 = vmatmul.mubr.msk.f32.gmra.mrb[12].mxu1 %vm439_vm2, %v4852_v59  ;;  %4270 = vmatmul.mubr.msk.f32.gmra.mrb[28].mxu0 %vm439_vm2, %v5635_v50  ;;  %v6070_v59 = vld [vmem:[#allocation45_spill] sm:$0xff] }
  0xf3   : > { %4048 = vmatprep.mubr.msk.f32.mxu1 %vm439_vm2, %v4875_v3  ;;  %4272 = vmatprep.mubr.msk.f32.mxu0 %vm439_vm2, %v2514_v26  ;;  %v6071_v3 = vld [vmem:[#allocation35_spill] sm:$0xff] }
  0xf6   : > { %4049 = vmatmul.mubr.msk.f32.gmra.mrb[14].mxu1 %vm439_vm2, %v4878_v7  ;;  %4273 = vmatmul.mubr.msk.f32.gmra.mrb[30].mxu0 %vm439_vm2, %v2516_v51  ;;  %v6072_v7 = vld [vmem:[#allocation46_spill] sm:$0xff] }
  0xf7   : > { %4051 = vmatprep.mubr.msk.f32.mxu1 %vm439_vm2, %v4916_v28  ;;  %4277 = vmatprep.mubr.msk.f32.mxu0 %vm439_vm2, %v4971_v21  ;;  %v2783_v28 = vrot.slane %v5486_v38, 2  ;;  %v2786_v21 = vrot.slane %v5624_v36, 2 }
  0xfa   : > { %4052 = vmatmul.mubr.msk.f32.gmra.mrb[16].mxu1 %vm439_vm2, %v4919_v29  ;;  %4278 = vmatmul.mubr.msk.f32.vlgmr.msra.gmra.mrb[0].mxu0 %vm439_vm2, %v6026_v5  ;;  %v2784_v29 = vrot.slane %v5497_v62, 2 }
  0xfb   : > { %4054 = vmatprep.mubr.msk.f32.mxu1 %vm439_vm2, %v4944_v53  ;;  %4280 = vmatprep.mubr.msk.f32.mxu0 %vm439_vm2, %v6027_v11  ;;  %v6075_v53 = vld [vmem:[#allocation48_spill] sm:$0xff] }
  0xfe   : > { %4055 = vmatmul.mubr.msk.f32.gmra.mrb[18].mxu1 %vm439_vm2, %v4947_v55  ;;  %4281 = vmatmul.mubr.msk.f32.gmra.mrb[2].mxu0 %vm439_vm2, %v6028_v47  ;;  %v6076_v55 = vld [vmem:[#allocation49_spill] sm:$0xff] }
  0xff   : > { %4057 = vmatprep.mubr.msk.f32.mxu1 %vm439_vm2, %v4976_v22  ;;  %4283 = vmatprep.mubr.msk.f32.mxu0 %vm439_vm2, %v6029_v63  ;;  %v6074_v22 = vld [vmem:[#allocation47_spill] sm:$0xff] }
 0x102   : > { %4058 = vmatmul.mubr.msk.f32.gmra.mrb[20].mxu1 %vm439_vm2, %v4979_v24  ;;  %4284 = vmatmul.mubr.msk.f32.gmra.mrb[4].mxu0 %vm439_vm2, %v6030_v23  ;;  %v2785_v24 = vsel %vm1025_vm3, %v2783_v28, %v2784_v29 }
 0x103   : > { %4060 = vmatprep.mubr.msk.f32.mxu1 %vm439_vm2, %v5018_v8  ;;  %4286 = vmatprep.mubr.msk.f32.mxu0 %vm439_vm2, %v6031_v57  ;;  %v6073_v8 = vld [vmem:[#allocation37_spill] sm:$0xff] }
 0x106   : > { %4061 = vmatmul.mubr.msk.f32.gmra.mrb[22].mxu1 %vm439_vm2, %v5021_v10  ;;  %4287 = vmatmul.mubr.msk.f32.gmra.mrb[6].mxu0 %vm439_vm2, %v6032_v30  ;;  %v6077_v10 = vld [vmem:[#allocation50_spill] sm:$0xff] }
 0x107   : > { %4063 = vmatprep.mubr.msk.f32.mxu1 %vm439_vm2, %v5055_v46  ;;  %4289 = vmatprep.mubr.msk.f32.mxu0 %vm439_vm2, %v5120_v19  ;;  %v6066_v46 = vld [vmem:[#allocation34_spill] sm:$0xff] }
 0x10a   : > { %4064 = vmatmul.mubr.msk.f32.gmra.mrb[24].mxu1 %vm439_vm2, %v5058_v12  ;;  %4290 = vmatmul.mubr.msk.f32.gmra.mrb[8].mxu0 %vm439_vm2, %v6033_v37  ;;  %v2787_v12 = vsel %vm1025_vm3, %v2784_v29, %v2786_v21 }
 0x10b   : > { %4066 = vmatprep.mubr.msk.f32.mxu1 %vm439_vm2, %v5090_v20  ;;  %4292 = vmatprep.mubr.msk.f32.mxu0 %vm439_vm2, %v5155_v39 }
 0x10e   : > { %4067 = vmatmul.mubr.msk.f32.gmra.mrb[26].mxu1 %vm439_vm2, %v5093_v54  ;;  %4293 = vmatmul.mubr.msk.f32.gmra.mrb[10].mxu0 %vm439_vm2, %v5172_v41 }
 0x10f   : > { %4069 = vmatprep.mubr.msk.f32.mxu1 %vm439_vm2, %v5125_v40  ;;  %4295 = vmatprep.mubr.msk.f32.mxu0 %vm439_vm2, %v5179_v13 }
 0x112   : > { %4070 = vmatmul.mubr.msk.f32.gmra.mrb[28].mxu1 %vm439_vm2, %v6066_v46  ;;  %4296 = vmatmul.mubr.msk.f32.gmra.mrb[12].mxu0 %vm439_vm2, %v5195_v17 }
 0x113   : > { %4072 = vmatprep.mubr.msk.f32.mxu1 %vm439_vm2, %v5300_v9  ;;  %4298 = vmatprep.mubr.msk.f32.mxu0 %vm439_vm2, %v5199_v61  ;;  %v6067_v9 = vld [vmem:[#allocation41_spill] sm:$0xff] }
 0x116   : > { %4073 = vmatmul.mubr.msk.f32.gmra.mrb[30].mxu1 %vm439_vm2, %v5303_v6  ;;  %4299 = vmatmul.mubr.msk.f32.gmra.mrb[14].mxu0 %vm439_vm2, %v5212_v45  ;;  %v6068_v6 = vld [vmem:[#allocation44_spill] sm:$0xff] }
 0x117   : > { %4101 = vmatprep.mubr.msk.f32.mxu1 %vm439_vm2, %v6050_v35  ;;  %4301 = vmatprep.mubr.msk.f32.mxu0 %vm439_vm2, %v5216_v0 }
 0x11a   : > { %4102 = vmatmul.mubr.msk.f32.vlgmr.msra.gmra.mrb[16].mxu1 %vm439_vm2, %v6051_v44  ;;  %4302 = vmatmul.mubr.msk.f32.gmra.mrb[16].mxu0 %vm439_vm2, %v5236_v16 }
 0x11b   : > { %4104 = vmatprep.mubr.msk.f32.mxu1 %vm439_vm2, %v6053_v27  ;;  %4304 = vmatprep.mubr.msk.f32.mxu0 %vm439_vm2, %v6067_v9 }
 0x11e   : > { %4105 = vmatmul.mubr.msk.f32.gmra.mrb[18].mxu1 %vm439_vm2, %v6055_v2  ;;  %4305 = vmatmul.mubr.msk.f32.gmra.mrb[18].mxu0 %vm439_vm2, %v5255_v56 }
 0x11f   : > { %4107 = vmatprep.mubr.msk.f32.mxu1 %vm439_vm2, %v6056_v48  ;;  %4307 = vmatprep.mubr.msk.f32.mxu0 %vm439_vm2, %v5259_v14  ;;  %v5787_v48 = vld [vmem:[%s5902_s2] ss:$0 sm:$0xff] }
 0x122   : > { %4108 = vmatmul.mubr.msk.f32.gmra.mrb[20].mxu1 %vm439_vm2, %v6057_v34  ;;  %4308 = vmatmul.mubr.msk.f32.gmra.mrb[20].mxu0 %vm439_vm2, %v6043_v4 }
 0x123   : > { %4110 = vmatprep.mubr.msk.f32.mxu1 %vm439_vm2, %v6058_v60  ;;  %4310 = vmatprep.mubr.msk.f32.mxu0 %vm439_vm2, %v6045_v49 }
 0x126   : > { %4111 = vmatmul.mubr.msk.f32.gmra.mrb[22].mxu1 %vm439_vm2, %v6059_v1  ;;  %4311 = vmatmul.mubr.msk.f32.gmra.mrb[22].mxu0 %vm439_vm2, %v6068_v6 }
 0x127   : > { %4113 = vmatprep.mubr.msk.f32.mxu1 %vm439_vm2, %v6069_v58  ;;  %4313 = vmatprep.mubr.msk.f32.mxu0 %vm439_vm2, %v6070_v59 }
 0x12a   : > { %4114 = vmatmul.mubr.msk.f32.gmra.mrb[24].mxu1 %vm439_vm2, %v6071_v3  ;;  %4314 = vmatmul.mubr.msk.f32.gmra.mrb[24].mxu0 %vm439_vm2, %v6072_v7 }
 0x12b   : > { %4116 = vmatprep.mubr.msk.f32.mxu1 %vm439_vm2, %v6073_v8  ;;  %4316 = vmatprep.mubr.msk.f32.mxu0 %vm439_vm2, %v6074_v22 }
 0x12e   : > { %4117 = vmatmul.mubr.msk.f32.gmra.mrb[26].mxu1 %vm439_vm2, %v6063_v33  ;;  %4317 = vmatmul.mubr.msk.f32.gmra.mrb[26].mxu0 %vm439_vm2, %v6075_v53 }
 0x12f   : > { %4119 = vmatprep.mubr.msk.f32.mxu1 %vm439_vm2, %v6064_v32  ;;  %4319 = vmatprep.mubr.msk.f32.mxu0 %vm439_vm2, %v6076_v55 }
 0x132   : > { %4120 = vmatmul.mubr.msk.f32.gmra.mrb[28].mxu1 %vm439_vm2, %v6065_v43  ;;  %4320 = vmatmul.mubr.msk.f32.gmra.mrb[28].mxu0 %vm439_vm2, %v6077_v10 }
 0x133   : > { %4122 = vmatprep.mubr.msk.f32.mxu1 %vm439_vm2, %v5621_v15  ;;  %4322 = vmatprep.mubr.msk.f32.mxu0 %vm439_vm2, %v2785_v24 }
 0x136   : > { %4123 = vmatmul.mubr.msk.f32.gmra.mrb[30].mxu1 %vm439_vm2, %v5635_v50  ;;  %4323 = vmatmul.mubr.msk.f32.gmra.mrb[30].mxu0 %vm439_vm2, %v2787_v12 }
 0x1ad   : > { %v4029_v40 = vpop.f32.mrb[0].mxu1 }
 0x1ae   : > { %v1509_v20 = vpop.f32.mrb[1].mxu1 }
 0x1b1   : > { %v4032_v54 = vpop.f32.mrb[2].mxu1 }
 0x1b2   : > { %v1519_v19 = vpop.f32.mrb[3].mxu1 }
 0x1b5   : > { %v4035_v13 = vpop.f32.mrb[4].mxu1 }
 0x1b6   : > { %v1529_v39 = vpop.f32.mrb[5].mxu1 }
 0x1b9   : > { %v4038_v41 = vpop.f32.mrb[6].mxu1 }
 0x1ba   : > { %v1539_v17 = vpop.f32.mrb[7].mxu1 }
 0x1bd   : > { %v4041_v61 = vpop.f32.mrb[8].mxu1 }
 0x1be   : > { %v1549_v45 = vpop.f32.mrb[9].mxu1 }
 0x1c1   : > { %v4044_v0 = vpop.f32.mrb[10].mxu1 }
 0x1c2   : > { %v1559_v16 = vpop.f32.mrb[11].mxu1 }
 0x1c5   : > { %v4047_v49 = vpop.f32.mrb[12].mxu1 }
 0x1c6   : > { %v1569_v56 = vpop.f32.mrb[13].mxu1 }
 0x1c9   : > { %v4050_v14 = vpop.f32.mrb[14].mxu1 }
 0x1ca   : > { %v5781_v36 = vpop.f32.mrb[15].mxu1 }
 0x1cd   : > { %v4279_v33 = vpop.f32.mrb[0].mxu0 }
 0x1ce   : > { %v4327_v5 = vadd.f32 %v4279_v33, %v4029_v40  ;;  %v2863_v11 = vpop.f32.mrb[1].mxu0 }
 0x1cf   : > { %v4328_v47 = vadd.f32 %v2863_v11, %v1509_v20 }
 0x1d0   : > { %v3062_v63 = vadd.f32 %v4327_v5, %v5787_v48 }
 0x1d1   : > { %v3061_v23 = vadd.f32 %v4328_v47, %v5787_v48  ;;  %v4282_v57 = vpop.f32.mrb[2].mxu0 }
 0x1d2   : > { %3095 = vst.msk [vmem:[%s5792_s20 + $0x8] sm:$0xff] %vm3093_vm4, %v3062_v63  ;;  %v4329_v30 = vadd.f32 %v4282_v57, %v4032_v54  ;;  %v2873_v38 = vpop.f32.mrb[3].mxu0 }
 0x1d3   : > { %3094 = vst.msk [vmem:[%s5792_s20] sm:$0xff] %vm3093_vm4, %v3061_v23  ;;  %v4330_v37 = vadd.f32 %v2873_v38, %v1519_v19 }
 0x1d4   : > { %v3064_v62 = vadd.f32 %v4329_v30, %v5787_v48 }
 0x1d5   : > { %v3063_v4 = vadd.f32 %v4330_v37, %v5787_v48  ;;  %v4285_v35 = vpop.f32.mrb[4].mxu0 }
 0x1d6   : > { %3097 = vst.msk [vmem:[%s5792_s20 + $0x18] sm:$0xff] %vm3093_vm4, %v3064_v62  ;;  %v4331_v44 = vadd.f32 %v4285_v35, %v4035_v13  ;;  %v2883_v27 = vpop.f32.mrb[5].mxu0 }
 0x1d7   : > { %3096 = vst.msk [vmem:[%s5792_s20 + $0x10] sm:$0xff] %vm3093_vm4, %v3063_v4  ;;  %v4332_v2 = vadd.f32 %v2883_v27, %v1529_v39 }
 0x1d8   : > { %v3066_v34 = vadd.f32 %v4331_v44, %v5787_v48 }
 0x1d9   : > { %v3065_v60 = vadd.f32 %v4332_v2, %v5787_v48  ;;  %v4288_v1 = vpop.f32.mrb[6].mxu0 }
 0x1da   : > { %3099 = vst.msk [vmem:[%s5792_s20 + $0x28] sm:$0xff] %vm3093_vm4, %v3066_v34  ;;  %v4333_v15 = vadd.f32 %v4288_v1, %v4038_v41  ;;  %v2893_v18 = vpop.f32.mrb[7].mxu0 }
 0x1db   : > { %3098 = vst.msk [vmem:[%s5792_s20 + $0x20] sm:$0xff] %vm3093_vm4, %v3065_v60  ;;  %v4334_v25 = vadd.f32 %v2893_v18, %v1539_v17 }
 0x1dc   : > { %v3068_v31 = vadd.f32 %v4333_v15, %v5787_v48 }
 0x1dd   : > { %v3067_v32 = vadd.f32 %v4334_v25, %v5787_v48  ;;  %v4291_v42 = vpop.f32.mrb[8].mxu0 }
 0x1de   : > { %3101 = vst.msk [vmem:[%s5792_s20 + $0x38] sm:$0xff] %vm3093_vm4, %v3068_v31  ;;  %v4335_v43 = vadd.f32 %v4291_v42, %v4041_v61  ;;  %v2903_v50 = vpop.f32.mrb[9].mxu0 }
 0x1df   : > { %3100 = vst.msk [vmem:[%s5792_s20 + $0x30] sm:$0xff] %vm3093_vm4, %v3067_v32  ;;  %v4336_v52 = vadd.f32 %v2903_v50, %v1549_v45 }
 0x1e0   : > { %v3070_v26 = vadd.f32 %v4335_v43, %v5787_v48 }
 0x1e1   : > { %v3069_v51 = vadd.f32 %v4336_v52, %v5787_v48  ;;  %v4294_v46 = vpop.f32.mrb[10].mxu0 }
 0x1e2   : > { %3103 = vst.msk [vmem:[%s5792_s20 + $0x48] sm:$0xff] %vm3093_vm4, %v3070_v26  ;;  %v4337_v9 = vadd.f32 %v4294_v46, %v4044_v0  ;;  %v2913_v6 = vpop.f32.mrb[11].mxu0 }
 0x1e3   : > { %3102 = vst.msk [vmem:[%s5792_s20 + $0x40] sm:$0xff] %vm3093_vm4, %v3069_v51  ;;  %v4338_v58 = vadd.f32 %v2913_v6, %v1559_v16 }
 0x1e4   : > { %v3072_v59 = vadd.f32 %v4337_v9, %v5787_v48 }
 0x1e5   : > { %v3071_v3 = vadd.f32 %v4338_v58, %v5787_v48  ;;  %v4297_v7 = vpop.f32.mrb[12].mxu0 }
 0x1e6   : > { %3105 = vst.msk [vmem:[%s5792_s20 + $0x58] sm:$0xff] %vm3093_vm4, %v3072_v59  ;;  %v4339_v8 = vadd.f32 %v4297_v7, %v4047_v49  ;;  %v2923_v22 = vpop.f32.mrb[13].mxu0 }
 0x1e7   : > { %3104 = vst.msk [vmem:[%s5792_s20 + $0x50] sm:$0xff] %vm3093_vm4, %v3071_v3  ;;  %v4340_v28 = vadd.f32 %v2923_v22, %v1569_v56 }
 0x1e8   : > { %v3074_v29 = vadd.f32 %v4339_v8, %v5787_v48 }
 0x1e9   : > { %v3073_v53 = vadd.f32 %v4340_v28, %v5787_v48  ;;  %v4300_v55 = vpop.f32.mrb[14].mxu0 }
 0x1ea   : > { %3107 = vst.msk [vmem:[%s5792_s20 + $0x68] sm:$0xff] %vm3093_vm4, %v3074_v29  ;;  %v4341_v21 = vadd.f32 %v4300_v55, %v4050_v14  ;;  %v2933_v24 = vpop.f32.mrb[15].mxu0 }
 0x1eb   : > { %3106 = vst.msk [vmem:[%s5792_s20 + $0x60] sm:$0xff] %vm3093_vm4, %v3073_v53  ;;  %v4342_v10 = vadd.f32 %v2933_v24, %v5781_v36 }
 0x1ec   : > { %v3076_v12 = vadd.f32 %v4341_v21, %v5787_v48 }
 0x1ed   : > { %v4103_v40 = vpop.f32.mrb[16].mxu1  ;;  %v3075_v20 = vadd.f32 %v4342_v10, %v5787_v48  ;;  %v4303_v54 = vpop.f32.mrb[16].mxu0 }
 0x1ee   : > { %v1861_v19 = vpop.f32.mrb[17].mxu1  ;;  %3109 = vst.msk [vmem:[%s5792_s20 + $0x78] sm:$0xff] %vm3093_vm4, %v3076_v12  ;;  %v4343_v13 = vadd.f32 %v4303_v54, %v4103_v40  ;;  %v2943_v39 = vpop.f32.mrb[17].mxu0 }
 0x1ef   : > { %3108 = vst.msk [vmem:[%s5792_s20 + $0x70] sm:$0xff] %vm3093_vm4, %v3075_v20  ;;  %v4344_v41 = vadd.f32 %v2943_v39, %v1861_v19 }
 0x1f0   : > { %v3078_v17 = vadd.f32 %v4343_v13, %v5787_v48 }
 0x1f1   : > { %v4106_v61 = vpop.f32.mrb[18].mxu1  ;;  %v3077_v45 = vadd.f32 %v4344_v41, %v5787_v48  ;;  %v4306_v0 = vpop.f32.mrb[18].mxu0 }
 0x1f2   : > { %v1871_v16 = vpop.f32.mrb[19].mxu1  ;;  %3111 = vst.msk [vmem:[%s5792_s20 + $0x88] sm:$0xff] %vm3093_vm4, %v3078_v17  ;;  %v4345_v49 = vadd.f32 %v4306_v0, %v4106_v61  ;;  %v2953_v56 = vpop.f32.mrb[19].mxu0 }
 0x1f3   : > { %3110 = vst.msk [vmem:[%s5792_s20 + $0x80] sm:$0xff] %vm3093_vm4, %v3077_v45  ;;  %v4346_v14 = vadd.f32 %v2953_v56, %v1871_v16 }
 0x1f4   : > { %v3080_v36 = vadd.f32 %v4345_v49, %v5787_v48 }
 0x1f5   : > { %v4109_v33 = vpop.f32.mrb[20].mxu1  ;;  %v3079_v5 = vadd.f32 %v4346_v14, %v5787_v48  ;;  %v4309_v11 = vpop.f32.mrb[20].mxu0 }
 0x1f6   : > { %v1881_v47 = vpop.f32.mrb[21].mxu1  ;;  %3113 = vst.msk [vmem:[%s5792_s20 + $0x98] sm:$0xff] %vm3093_vm4, %v3080_v36  ;;  %v4347_v63 = vadd.f32 %v4309_v11, %v4109_v33  ;;  %v2963_v23 = vpop.f32.mrb[21].mxu0 }
 0x1f7   : > { %3112 = vst.msk [vmem:[%s5792_s20 + $0x90] sm:$0xff] %vm3093_vm4, %v3079_v5  ;;  %v4348_v57 = vadd.f32 %v2963_v23, %v1881_v47 }
 0x1f8   : > { %v3082_v30 = vadd.f32 %v4347_v63, %v5787_v48 }
 0x1f9   : > { %v4112_v38 = vpop.f32.mrb[22].mxu1  ;;  %v3081_v37 = vadd.f32 %v4348_v57, %v5787_v48  ;;  %v4312_v62 = vpop.f32.mrb[22].mxu0 }
 0x1fa   : > { %v1891_v4 = vpop.f32.mrb[23].mxu1  ;;  %3115 = vst.msk [vmem:[%s5792_s20 + $0xa8] sm:$0xff] %vm3093_vm4, %v3082_v30  ;;  %v4349_v35 = vadd.f32 %v4312_v62, %v4112_v38  ;;  %v2973_v44 = vpop.f32.mrb[23].mxu0 }
 0x1fb   : > { %3114 = vst.msk [vmem:[%s5792_s20 + $0xa0] sm:$0xff] %vm3093_vm4, %v3081_v37  ;;  %v4350_v27 = vadd.f32 %v2973_v44, %v1891_v4 }
 0x1fc   : > { %v3084_v2 = vadd.f32 %v4349_v35, %v5787_v48 }
 0x1fd   : > { %v4115_v34 = vpop.f32.mrb[24].mxu1  ;;  %v3083_v60 = vadd.f32 %v4350_v27, %v5787_v48  ;;  %v4315_v1 = vpop.f32.mrb[24].mxu0 }
 0x1fe   : > { %v1901_v15 = vpop.f32.mrb[25].mxu1  ;;  %3117 = vst.msk [vmem:[%s5792_s20 + $0xb8] sm:$0xff] %vm3093_vm4, %v3084_v2  ;;  %v4351_v18 = vadd.f32 %v4315_v1, %v4115_v34  ;;  %v2983_v25 = vpop.f32.mrb[25].mxu0 }
 0x1ff   : > { %3116 = vst.msk [vmem:[%s5792_s20 + $0xb0] sm:$0xff] %vm3093_vm4, %v3083_v60  ;;  %v4352_v31 = vadd.f32 %v2983_v25, %v1901_v15 }
 0x200   : > { %v3086_v32 = vadd.f32 %v4351_v18, %v5787_v48 }
 0x201   : > { %v4118_v42 = vpop.f32.mrb[26].mxu1  ;;  %v3085_v43 = vadd.f32 %v4352_v31, %v5787_v48  ;;  %v4318_v50 = vpop.f32.mrb[26].mxu0 }
 0x202   : > { %v1911_v52 = vpop.f32.mrb[27].mxu1  ;;  %3119 = vst.msk [vmem:[%s5792_s20 + $0xc8] sm:$0xff] %vm3093_vm4, %v3086_v32  ;;  %v4353_v26 = vadd.f32 %v4318_v50, %v4118_v42  ;;  %v2993_v51 = vpop.f32.mrb[27].mxu0 }
 0x203   : > { %3118 = vst.msk [vmem:[%s5792_s20 + $0xc0] sm:$0xff] %vm3093_vm4, %v3085_v43  ;;  %v4354_v46 = vadd.f32 %v2993_v51, %v1911_v52 }
 0x204   : > { %v3088_v9 = vadd.f32 %v4353_v26, %v5787_v48 }
 0x205   : > { %v4121_v6 = vpop.f32.mrb[28].mxu1  ;;  %v3087_v58 = vadd.f32 %v4354_v46, %v5787_v48  ;;  %v4321_v59 = vpop.f32.mrb[28].mxu0 }
 0x206   : > { %v1921_v3 = vpop.f32.mrb[29].mxu1  ;;  %3121 = vst.msk [vmem:[%s5792_s20 + $0xd8] sm:$0xff] %vm3093_vm4, %v3088_v9  ;;  %v4355_v7 = vadd.f32 %v4321_v59, %v4121_v6  ;;  %v3003_v8 = vpop.f32.mrb[29].mxu0 }
 0x207   : > { %3120 = vst.msk [vmem:[%s5792_s20 + $0xd0] sm:$0xff] %vm3093_vm4, %v3087_v58  ;;  %v4356_v22 = vadd.f32 %v3003_v8, %v1921_v3 }
 0x208   : > { %v3090_v28 = vadd.f32 %v4355_v7, %v5787_v48 }
 0x209   : > { %v4124_v29 = vpop.f32.mrb[30].mxu1  ;;  %v3089_v53 = vadd.f32 %v4356_v22, %v5787_v48  ;;  %v4324_v55 = vpop.f32.mrb[30].mxu0 }
 0x20a   : > { %v1931_v21 = vpop.f32.mrb[31].mxu1  ;;  %3123 = vst.msk [vmem:[%s5792_s20 + $0xe8] sm:$0xff] %vm3093_vm4, %v3090_v28  ;;  %v4357_v24 = vadd.f32 %v4324_v55, %v4124_v29  ;;  %v3013_v10 = vpop.f32.mrb[31].mxu0 }
 0x20b   : > { %3122 = vst.msk [vmem:[%s5792_s20 + $0xe0] sm:$0xff] %vm3093_vm4, %v3089_v53  ;;  %v4358_v12 = vadd.f32 %v3013_v10, %v1931_v21 }
 0x20c   : > { %v3092_v40 = vadd.f32 %v4357_v24, %v5787_v48 }
 0x20d   : > { %v3091_v20 = vadd.f32 %v4358_v12, %v5787_v48 }
 0x20e   : > { %3125 = vst.msk [vmem:[%s5792_s20 + $0xf8] sm:$0xff] %vm3093_vm4, %v3092_v40 }
 0x20f   : > { %3124 = vst.msk [vmem:[%s5792_s20 + $0xf0] sm:$0xff] %vm3093_vm4, %v3091_v20 }
 0x210 PF: > { %s13_s14 = sadd.s32 1, %s4630_s14   ;;  %s6078_s12 = smov %s4626_s13 }
 0x211   : > { %p10_p5 = scmp.ge.s32.totalorder %s13_s14, 4   ;;  %s6079_s13 = smov %s6081_s15 }
 0x213   :  { %12 = sbr.rel (!%p10_p5) target bundleno = 2 (0x2), region = 76 }

</bundles_post_ra>
